<compile_context>
chip_gen: v7x
topology: tpu7x:2x2x1
jax: 0.10.0
libtpu: 0.0.40
codegen_flags: <defaults>
</compile_context>

<pallas_src>
import functools

import jax
import jax.numpy as jnp
from jax.experimental import pallas as pl
from jax.experimental.pallas import tpu as pltpu

EPS_MSG = 1e-7   # GENConv message eps
EPS_LN = 1e-5    # LayerNorm eps

_PARALLEL = pltpu.CompilerParams(dimension_semantics=("parallel",))
_ARBITRARY = pltpu.CompilerParams(dimension_semantics=("arbitrary",))


def _round_up(x, m):
    return ((x + m - 1) // m) * m


def _choose_tiles(n):
    """Padded node count, dst-row tile tm, src-col tile tk for the aggregation kernel."""
    if n <= 32:
        tm = 16
    elif n <= 256:
        tm = _round_up((n + 1) // 2, 16)   # >= 2 dst tiles -> both v7x TensorCores get work
    else:
        tm = 128                            # v7x (64 MiB VMEM) safe cap
    n_pad = _round_up(max(n, 16), tm)
    if n_pad <= 512:
        tk = n_pad                          # single src panel, full-width (lane rule satisfied)
    else:
        tk = 512                            # multiple of 128 -> lane-rule OK, K-tiled accumulation
        n_pad = _round_up(n_pad, tk)        # tm=128 divides 512
    return n_pad, tm, tk


def _ln_f32(x, w, b):
    """Node-wise LayerNorm in f32 (statistics always f32)."""
    mu = jnp.mean(x, axis=-1, keepdims=True)
    xc = x - mu
    var = jnp.mean(xc * xc, axis=-1, keepdims=True)
    return xc * jax.lax.rsqrt(var + EPS_LN) * w + b


# ---------------------------------------------------------------------------
# Kernel 1a: prep (optional input LayerNorm + fused lin_src|lin_dst matmul + running channel max)
# ---------------------------------------------------------------------------
def _prep_kernel(x_ref, lnw_ref, lnb_ref, w_ref, b_ref, feat_ref, smax_ref, *, do_ln, hdim):
    x = x_ref[...]
    if do_ln:
        x = _ln_f32(x, lnw_ref[...], lnb_ref[...])
    y = jnp.dot(x.astype(jnp.bfloat16), w_ref[...],
                preferred_element_type=jnp.float32) + b_ref[...]
    feat_ref[...] = y.astype(feat_ref.dtype)

    # running per-channel max of m = relu(h_src) + eps (global stabilization constant;
    # it cancels exactly in num/den, only numerical range matters)
    m = jnp.maximum(y[:, :hdim], 0.0) + EPS_MSG
    tmax = jnp.max(m, axis=0, keepdims=True)
    i = pl.program_id(0)

    @pl.when(i == 0)
    def _():
        smax_ref[...] = tmax

    @pl.when(i > 0)
    def _():
        smax_ref[...] = jnp.maximum(smax_ref[...], tmax)


def prep_split(x, w_bf16, b, ln_w, ln_b, *, do_ln, hdim, tm):
    n, fin = x.shape
    fout = w_bf16.shape[1]
    return pl.pallas_call(
        functools.partial(_prep_kernel, do_ln=do_ln, hdim=hdim),
        out_shape=(jax.ShapeDtypeStruct((n, fout), jnp.float32),
                   jax.ShapeDtypeStruct((1, hdim), jnp.float32)),
        grid=(n // tm,),
        in_specs=[
            pl.BlockSpec((tm, fin), lambda i: (i, 0)),
            pl.BlockSpec((1, fin), lambda i: (0, 0)),
            pl.BlockSpec((1, fin), lambda i: (0, 0)),
            pl.BlockSpec((fin, fout), lambda i: (0, 0)),
            pl.BlockSpec((1, fout), lambda i: (0, 0)),
        ],
        out_specs=(pl.BlockSpec((tm, fout), lambda i: (i, 0)),
                   pl.BlockSpec((1, hdim), lambda i: (0, 0))),      # resident accumulator
        compiler_params=_ARBITRARY,
    )(x, ln_w.reshape(1, fin), ln_b.reshape(1, fin), w_bf16, b.reshape(1, fout))


# ---------------------------------------------------------------------------
# Kernel 1b: channel max only (layers whose input already has hidden width -> no lin_src/dst)
# ---------------------------------------------------------------------------
def _chan_max_kernel(x_ref, o_ref):
    m = jnp.maximum(x_ref[...], 0.0) + EPS_MSG
    tmax = jnp.max(m, axis=0, keepdims=True)
    i = pl.program_id(0)

    @pl.when(i == 0)
    def _():
        o_ref[...] = tmax

    @pl.when(i > 0)
    def _():
        o_ref[...] = jnp.maximum(o_ref[...], tmax)


def chan_max(x, *, tm):
    n, c = x.shape
    return pl.pallas_call(
        _chan_max_kernel,
        out_shape=jax.ShapeDtypeStruct((1, c), jnp.float32),
        grid=(n // tm,),
        in_specs=[pl.BlockSpec((tm, c), lambda i: (i, 0))],
        out_specs=pl.BlockSpec((1, c), lambda i: (0, 0)),
        compiler_params=_ARBITRARY,
    )(x)


# ---------------------------------------------------------------------------
# Kernel 2: message construction (hoisted out of the aggregation): rhs = [p*m | p] in bf16
# ---------------------------------------------------------------------------
def _msg_kernel(t_ref, feat_ref, smax_ref, rhs_ref, *, hdim, split):
    t = t_ref[0, 0]
    f = feat_ref[...]
    hs = f[:, :hdim] if split else f
    m = jnp.maximum(hs, 0.0) + EPS_MSG
    p = jnp.exp(t * (m - smax_ref[...]))
    # numerator lanes first (lane 0) so the agg slice added to x_dst needs no realign
    rhs_ref[:, :hdim] = (p * m).astype(rhs_ref.dtype)
    rhs_ref[:, hdim:] = p.astype(rhs_ref.dtype)


def build_messages(t, feat, smax, *, hdim, split, tm):
    n, fw = feat.shape
    return pl.pallas_call(
        functools.partial(_msg_kernel, hdim=hdim, split=split),
        out_shape=jax.ShapeDtypeStruct((n, 2 * hdim), jnp.bfloat16),
        grid=(n // tm,),
        in_specs=[
            pl.BlockSpec(memory_space=pltpu.MemorySpace.SMEM),   # t (learnable temperature)
            pl.BlockSpec((tm, fw), lambda i: (i, 0)),
            pl.BlockSpec((1, hdim), lambda i: (0, 0)),
        ],
        out_specs=pl.BlockSpec((tm, 2 * hdim), lambda i: (i, 0)),
        compiler_params=_PARALLEL,
    )(t, feat, smax)


# ---------------------------------------------------------------------------
# Kernel 3: aggregation (K-tiled, bf16 MXU) + GENConv MLP + outer LayerNorm (+ fused heads)
# ---------------------------------------------------------------------------
def _gen_layer_kernel(adj_ref, rhs_ref, xd_ref, w1_ref, b1_ref, lw_ref, lb_ref,
                      w2_ref, b2_ref, nw_ref, nb_ref, *rest,
                      hdim, split, outer_norm, final_relu, with_heads):
    if with_heads:
        hw1_ref, hb1_ref, hw2_ref, hb2_ref, o_ref, acc_ref = rest
    else:
        o_ref, acc_ref = rest

    k = pl.program_id(1)

    @pl.when(k == 0)
    def _():
        acc_ref[...] = jnp.zeros_like(acc_ref)

    # single MXU pass (bf16) accumulating both numerator and denominator into f32 scratch
    acc_ref[...] += jnp.dot(adj_ref[...], rhs_ref[...], preferred_element_type=jnp.float32)

    @pl.when(k == pl.num_programs(1) - 1)
    def _():
        agg = acc_ref[...]
        num = agg[:, :hdim]
        den = agg[:, hdim:]
        xd = xd_ref[...][:, hdim:] if split else xd_ref[...]
        inv = pl.reciprocal(jnp.maximum(den, 1e-12), approx=True)   # isolated dst -> num==0 -> 0
        out = num * inv + xd                                        # aggregation + residual x_dst

        # GENConv internal MLP: Linear -> LayerNorm -> ReLU -> (dropout=identity) -> Linear
        h1 = jnp.dot(out.astype(jnp.bfloat16), w1_ref[...],
                     preferred_element_type=jnp.float32) + b1_ref[...]
        h1 = jnp.maximum(_ln_f32(h1, lw_ref[...], lb_ref[...]), 0.0)
        h2 = jnp.dot(h1.astype(jnp.bfloat16), w2_ref[...],
                     preferred_element_type=jnp.float32) + b2_ref[...]

        if outer_norm:
            h2 = _ln_f32(h2, nw_ref[...], nb_ref[...])
        if final_relu:
            h2 = jnp.maximum(h2, 0.0)
        if with_heads:
            # fused rtt/retrans heads; second weight block-diagonal and lane-padded to 128
            hh = jnp.maximum(
                jnp.dot(h2.astype(jnp.bfloat16), hw1_ref[...],
                        preferred_element_type=jnp.float32) + hb1_ref[...], 0.0)
            h2 = jnp.dot(hh.astype(jnp.bfloat16), hw2_ref[...],
                         preferred_element_type=jnp.float32) + hb2_ref[...]
        o_ref[...] = h2.astype(o_ref.dtype)


def gen_conv_layer(adj, rhs, xd_src, cp, norm_p, hdim, *, split, outer_norm, final_relu,
                   head_params=None, tm, tk):
    n = adj.shape[0]
    fw = xd_src.shape[1]
    with_heads = head_params is not None
    out_w = 128 if with_heads else hdim

    in_specs = [
        pl.BlockSpec((tm, tk), lambda i, k: (i, k)),            # adjacency tile (bf16)
        pl.BlockSpec((tk, 2 * hdim), lambda i, k: (k, 0)),      # message RHS tile (bf16)
        pl.BlockSpec((tm, fw), lambda i, k: (i, 0)),            # x_dst rows (resident across k)
        pl.BlockSpec((hdim, 2 * hdim), lambda i, k: (0, 0)),    # mlp lin1 W (bf16)
        pl.BlockSpec((1, 2 * hdim), lambda i, k: (0, 0)),       # mlp lin1 b
        pl.BlockSpec((1, 2 * hdim), lambda i, k: (0, 0)),       # mlp LN w
        pl.BlockSpec((1, 2 * hdim), lambda i, k: (0, 0)),       # mlp LN b
        pl.BlockSpec((2 * hdim, hdim), lambda i, k: (0, 0)),    # mlp lin2 W (bf16)
        pl.BlockSpec((1, hdim), lambda i, k: (0, 0)),           # mlp lin2 b
        pl.BlockSpec((1, hdim), lambda i, k: (0, 0)),           # outer LN w
        pl.BlockSpec((1, hdim), lambda i, k: (0, 0)),           # outer LN b
    ]
    args = [adj, rhs, xd_src,
            cp["mlp_lin1"]["w"].astype(jnp.bfloat16), cp["mlp_lin1"]["b"].reshape(1, 2 * hdim),
            cp["mlp_norm"]["w"].reshape(1, 2 * hdim), cp["mlp_norm"]["b"].reshape(1, 2 * hdim),
            cp["mlp_lin2"]["w"].astype(jnp.bfloat16), cp["mlp_lin2"]["b"].reshape(1, hdim),
            norm_p["w"].reshape(1, hdim), norm_p["b"].reshape(1, hdim)]

    if with_heads:
        hw1, hb1, hw2, hb2 = head_params
        c1 = hw1.shape[1]
        in_specs += [
            pl.BlockSpec((hdim, c1), lambda i, k: (0, 0)),      # heads lin1 W (bf16)
            pl.BlockSpec((1, c1), lambda i, k: (0, 0)),         # heads lin1 b
            pl.BlockSpec((c1, 128), lambda i, k: (0, 0)),       # heads lin2 W, lane-padded (bf16)
            pl.BlockSpec((1, 128), lambda i, k: (0, 0)),        # heads lin2 b, lane-padded
        ]
        args += [hw1.astype(jnp.bfloat16), hb1.reshape(1, c1),
                 hw2.astype(jnp.bfloat16), hb2.reshape(1, 128)]

    mlp_flops = n * (2 * hdim * (2 * hdim) * 2) * 2
    cost = pl.CostEstimate(
        flops=2 * n * n * (2 * hdim) + mlp_flops,
        transcendentals=n * hdim,
        bytes_accessed=n * n * 2 + n * (2 * hdim) * 2 + n * fw * 4 + n * out_w * 4)

    kernel = functools.partial(_gen_layer_kernel, hdim=hdim, split=split,
                               outer_norm=outer_norm, final_relu=final_relu,
                               with_heads=with_heads)
    return pl.pallas_call(
        kernel,
        out_shape=jax.ShapeDtypeStruct((n, out_w), jnp.float32),
        grid=(n // tm, n // tk),
        in_specs=in_specs,
        out_specs=pl.BlockSpec((tm, out_w), lambda i, k: (i, 0)),
        scratch_shapes=[pltpu.VMEM((tm, 2 * hdim), jnp.float32)],
        compiler_params=pltpu.CompilerParams(
            dimension_semantics=("parallel", "arbitrary"),
            vmem_limit_bytes=32 * 1024 * 1024),
        cost_estimate=cost,
    )(*args)


# ---------------------------------------------------------------------------
# Standalone node-wise LayerNorm (only for the rare config num_node_features == hidden_channels)
# ---------------------------------------------------------------------------
def _layer_norm_kernel(x_ref, w_ref, b_ref, o_ref):
    o_ref[...] = _ln_f32(x_ref[...], w_ref[...], b_ref[...]).astype(o_ref.dtype)


def layer_norm(x, w, b, *, tm):
    n, c = x.shape
    return pl.pallas_call(
        _layer_norm_kernel,
        out_shape=jax.ShapeDtypeStruct((n, c), jnp.float32),
        grid=(n // tm,),
        in_specs=[
            pl.BlockSpec((tm, c), lambda i: (i, 0)),
            pl.BlockSpec((1, c), lambda i: (0, 0)),
            pl.BlockSpec((1, c), lambda i: (0, 0)),
        ],
        out_specs=pl.BlockSpec((tm, c), lambda i: (i, 0)),
        compiler_params=_PARALLEL,
    )(x, w.reshape(1, c), b.reshape(1, c))


# ---------------------------------------------------------------------------
# Parameter construction (deterministic, xavier_uniform gain=0.5, zero biases)
# ---------------------------------------------------------------------------
def _xavier_uniform(key, fin, fout, gain=0.5):
    limit = gain * (6.0 / (fin + fout)) ** 0.5
    return jax.random.uniform(key, (fin, fout), jnp.float32, -limit, limit)


def _init_linear(key, fin, fout):
    return {"w": _xavier_uniform(key, fin, fout), "b": jnp.zeros((fout,), jnp.float32)}


def _init_layernorm(c):
    return {"w": jnp.ones((c,), jnp.float32), "b": jnp.zeros((c,), jnp.float32)}


def _init_genconv(key, cin, cout):
    ks = jax.random.split(key, 4)
    p = {
        "t": jnp.float32(1.0),
        "mlp_lin1": _init_linear(ks[0], cout, 2 * cout),
        "mlp_norm": _init_layernorm(2 * cout),
        "mlp_lin2": _init_linear(ks[1], 2 * cout, cout),
    }
    if cin != cout:
        p["lin_src"] = _init_linear(ks[2], cin, cout)
        p["lin_dst"] = _init_linear(ks[3], cin, cout)
    return p


def init_params(key, num_node_features, hidden_channels, num_layers):
    keys = jax.random.split(key, num_layers + 4)
    convs, norms = [], []
    cin = num_node_features
    for i in range(num_layers):
        convs.append(_init_genconv(keys[i], cin, hidden_channels))
        norms.append(_init_layernorm(hidden_channels))
        cin = hidden_channels
    half = hidden_channels // 2
    return {
        "input_norm": _init_layernorm(num_node_features),
        "convs": convs,
        "norms": norms,
        "rtt1": _init_linear(keys[num_layers + 0], hidden_channels, half),
        "rtt2": _init_linear(keys[num_layers + 1], half, 1),
        "ret1": _init_linear(keys[num_layers + 2], hidden_channels, half),
        "ret2": _init_linear(keys[num_layers + 3], half, 1),
    }


# ---------------------------------------------------------------------------
# Forward pass (graph glue in plain JAX, hot path in fused Pallas kernels)
# ---------------------------------------------------------------------------
def model_forward(params, x, edge_index):
    n, f = x.shape
    hdim = params["norms"][0]["w"].shape[0]

    n_pad, tm, tk = _choose_tiles(n)
    tm_feat = n_pad if n_pad <= 1024 else 512   # big row tiles for feature-only kernels

    # dense adjacency A[dst, src] with edge multiplicities (bf16 exact up to 256 per edge pair)
    src, dst = edge_index[0], edge_index[1]
    adj = jnp.zeros((n_pad, n_pad), jnp.float32).at[dst, src].add(1.0).astype(jnp.bfloat16)
    h = jnp.zeros((n_pad, f), jnp.float32).at[:n, :].set(x)

    use_norm = n > 1
    nconv = len(params["convs"])

    # Rare config (num_node_features == hidden): input_norm can't be fused into lin_src/dst.
    if use_norm and "lin_src" not in params["convs"][0]:
        h = layer_norm(h, params["input_norm"]["w"], params["input_norm"]["b"], tm=tm_feat)

    # prediction-head weights: [rtt1|ret1], then block-diagonal second weight lane-padded to 128
    half = hdim // 2
    hw1 = jnp.concatenate([params["rtt1"]["w"], params["ret1"]["w"]], axis=1)
    hb1 = jnp.concatenate([params["rtt1"]["b"], params["ret1"]["b"]], axis=0)
    hw2 = jnp.zeros((2 * half, 128), jnp.float32)
    hw2 = hw2.at[:half, 0:1].set(params["rtt2"]["w"]).at[half:, 1:2].set(params["ret2"]["w"])
    hb2 = jnp.zeros((128,), jnp.float32)
    hb2 = hb2.at[0].set(params["rtt2"]["b"][0]).at[1].set(params["ret2"]["b"][0])

    for i, (cp, ln_p) in enumerate(zip(params["convs"], params["norms"])):
        last = i == nconv - 1
        t = jnp.asarray(cp["t"], jnp.float32).reshape(1, 1)

        if "lin_src" in cp:
            # fused [lin_src | lin_dst] matmul (+ input LayerNorm for the first layer) + channel max
            w_sd = jnp.concatenate([cp["lin_src"]["w"], cp["lin_dst"]["w"]],
                                   axis=1).astype(jnp.bfloat16)
            b_sd = jnp.concatenate([cp["lin_src"]["b"], cp["lin_dst"]["b"]], axis=0)
            feat, smax = prep_split(h, w_sd, b_sd,
                                    params["input_norm"]["w"], params["input_norm"]["b"],
                                    do_ln=(i == 0 and use_norm), hdim=hdim, tm=tm_feat)
            split = True
        else:
            feat = h
            smax = chan_max(h, tm=tm_feat)
            split = False

        # hoisted message construction (once per layer, bf16 RHS for the MXU)
        rhs = build_messages(t, feat, smax, hdim=hdim, split=split, tm=tm_feat)

        head_params = (hw1, hb1, hw2, hb2) if last else None
        h = gen_conv_layer(adj, rhs, feat, cp, ln_p, hdim, split=split,
                           outer_norm=use_norm, final_relu=not last,
                           head_params=head_params, tm=tm, tk=tk)
        # F.dropout(training=False) is identity

    # last layer output is lane-padded to 128; first two lanes are [rtt_pred, retrans_pred]
    return h[:n, :2]


# ---------------------------------------------------------------------------
if __name__ == "__main__":
    NUM_NODE_FEATURES = 8
    HIDDEN = 32
    NUM_LAYERS = 2
    N_NODES = 16
    N_EDGES = 48

    root = jax.random.PRNGKey(0)
    k_x, k_e, k_p = jax.random.split(root, 3)

    x = jax.random.normal(k_x, (N_NODES, NUM_NODE_FEATURES), jnp.float32)
    edge_index = jax.random.randint(k_e, (2, N_EDGES), 0, N_NODES, jnp.int32)

    params = init_params(k_p, NUM_NODE_FEATURES, HIDDEN, NUM_LAYERS)

    fwd = jax.jit(model_forward)
    out = fwd(params, x, edge_index)
    out = jax.block_until_ready(out)

    assert out.shape == (N_NODES, 2), out.shape
    assert bool(jnp.all(jnp.isfinite(out))), "non-finite output"
    print("KERNEL_OK")
</pallas_src>

<mosaic_0001>
module attributes {stable_mosaic.version = 11 : i64} {
  func.func private @main(%arg0: i32) attributes {dimension_semantics = [#tpu.dimension_semantics<core_parallel>], iteration_bounds = array<i64: 2>, tpu.core_type = #tpu.core_type<sc_scalar_subcore>, window_params = []} {
    return
  }
}

module attributes {stable_mosaic.version = 11 : i64} {
  func.func private @main(%arg0: i32) attributes {dimension_semantics = [#tpu.dimension_semantics<core_parallel>], iteration_bounds = array<i64: 2>, tpu.core_type = #tpu.core_type<sc_scalar_subcore>, window_params = []} {
    return
  }
}

module attributes {stable_mosaic.version = 11 : i64} {
  func.func @_prep_kernel(%arg0: i32, %arg1: memref<16x8xf32, #tpu.memory_space<vmem>>, %arg2: memref<1x8xf32, #tpu.memory_space<vmem>>, %arg3: memref<1x8xf32, #tpu.memory_space<vmem>>, %arg4: memref<8x64xbf16, #tpu.memory_space<vmem>>, %arg5: memref<1x64xf32, #tpu.memory_space<vmem>>, %arg6: memref<16x64xf32, #tpu.memory_space<vmem>>, %arg7: memref<1x32xf32, #tpu.memory_space<vmem>>) attributes {dimension_semantics = [#tpu.dimension_semantics<arbitrary>], iteration_bounds = array<i64: 1>, scalar_prefetch = 0 : i64, scratch_operands = 0 : i64, tpu.core_type = #tpu.core_type<tc>, window_params = [{transform_indices = @transform_0, window_bounds = array<i64: 16, 8>}, {pipeline_mode = #tpu.pipeline_mode<synchronous>, transform_indices = @transform_1, window_bounds = array<i64: 1, 8>}, {pipeline_mode = #tpu.pipeline_mode<synchronous>, transform_indices = @transform_2, window_bounds = array<i64: 1, 8>}, {pipeline_mode = #tpu.pipeline_mode<synchronous>, transform_indices = @transform_3, window_bounds = array<i64: 8, 64>}, {pipeline_mode = #tpu.pipeline_mode<synchronous>, transform_indices = @transform_4, window_bounds = array<i64: 1, 64>}, {transform_indices = @transform_5, window_bounds = array<i64: 16, 64>}, {pipeline_mode = #tpu.pipeline_mode<synchronous>, transform_indices = @transform_6, window_bounds = array<i64: 1, 32>}]} {
    %c0 = arith.constant 0 : index
    %c0_0 = arith.constant 0 : index
    %0 = vector.load %arg1[%c0, %c0_0] : memref<16x8xf32, #tpu.memory_space<vmem>>, vector<16x8xf32>
    %c0_1 = arith.constant 0 : index
    %c0_2 = arith.constant 0 : index
    %1 = vector.load %arg2[%c0_1, %c0_2] : memref<1x8xf32, #tpu.memory_space<vmem>>, vector<1x8xf32>
    %c0_3 = arith.constant 0 : index
    %c0_4 = arith.constant 0 : index
    %2 = vector.load %arg3[%c0_3, %c0_4] : memref<1x8xf32, #tpu.memory_space<vmem>>, vector<1x8xf32>
    %cst = arith.constant dense<0.000000e+00> : vector<16xf32>
    %3 = vector.multi_reduction <add>, %0, %cst [1] : vector<16x8xf32> to vector<16xf32>
    %4 = vector.shape_cast %3 : vector<16xf32> to vector<16x1xf32>
    %cst_5 = arith.constant 8.000000e+00 : f32
    %5 = vector.broadcast %cst_5 : f32 to vector<16x1xf32>
    %6 = arith.divf %4, %5 : vector<16x1xf32>
    %7 = vector.broadcast %6 : vector<16x1xf32> to vector<16x8xf32>
    %8 = arith.subf %0, %7 : vector<16x8xf32>
    %9 = arith.mulf %8, %8 : vector<16x8xf32>
    %cst_6 = arith.constant dense<0.000000e+00> : vector<16xf32>
    %10 = vector.multi_reduction <add>, %9, %cst_6 [1] : vector<16x8xf32> to vector<16xf32>
    %11 = vector.shape_cast %10 : vector<16xf32> to vector<16x1xf32>
    %cst_7 = arith.constant 8.000000e+00 : f32
    %12 = vector.broadcast %cst_7 : f32 to vector<16x1xf32>
    %13 = arith.divf %11, %12 : vector<16x1xf32>
    %cst_8 = arith.constant 9.99999974E-6 : f32
    %14 = vector.broadcast %cst_8 : f32 to vector<16x1xf32>
    %15 = arith.addf %13, %14 : vector<16x1xf32>
    %16 = math.rsqrt %15 : vector<16x1xf32>
    %17 = vector.broadcast %16 : vector<16x1xf32> to vector<16x8xf32>
    %18 = arith.mulf %8, %17 : vector<16x8xf32>
    %19 = vector.broadcast %1 : vector<1x8xf32> to vector<16x8xf32>
    %20 = arith.mulf %18, %19 : vector<16x8xf32>
    %21 = vector.broadcast %2 : vector<1x8xf32> to vector<16x8xf32>
    %22 = arith.addf %20, %21 : vector<16x8xf32>
    %23 = arith.truncf %22 : vector<16x8xf32> to vector<16x8xbf16>
    %c0_9 = arith.constant 0 : index
    %c0_10 = arith.constant 0 : index
    %24 = vector.load %arg4[%c0_9, %c0_10] : memref<8x64xbf16, #tpu.memory_space<vmem>>, vector<8x64xbf16>
    %cst_11 = arith.constant dense<0.000000e+00> : vector<16x64xf32>
    %25 = tpu.matmul %23, %24, %cst_11 {dimension_numbers = #tpu.dot_dimension_numbers<[1], [0], [0], [1], [0, 0, 1, 1], [], []>} : vector<16x8xbf16>, vector<8x64xbf16>, vector<16x64xf32> -> vector<16x64xf32>
    %c0_12 = arith.constant 0 : index
    %c0_13 = arith.constant 0 : index
    %26 = vector.load %arg5[%c0_12, %c0_13] : memref<1x64xf32, #tpu.memory_space<vmem>>, vector<1x64xf32>
    %27 = vector.broadcast %26 : vector<1x64xf32> to vector<16x64xf32>
    %28 = arith.addf %25, %27 : vector<16x64xf32>
    %c0_14 = arith.constant 0 : index
    %c0_15 = arith.constant 0 : index
    %29 = vector.load %arg6[%c0_14, %c0_15] : memref<16x64xf32, #tpu.memory_space<vmem>>, vector<16x64xf32>
    tpu.vector_store %arg6[%c0_14, %c0_15], %28 {strides = array<i32>} : memref<16x64xf32, #tpu.memory_space<vmem>>, vector<16x64xf32>,
    %30 = vector.extract_strided_slice %28 {offsets = [0, 0], sizes = [16, 32], strides = [1, 1]} : vector<16x64xf32> to vector<16x32xf32>
    %cst_16 = arith.constant 0.000000e+00 : f32
    %31 = vector.broadcast %cst_16 : f32 to vector<16x32xf32>
    %32 = arith.maximumf %30, %31 : vector<16x32xf32>
    %cst_17 = arith.constant 1.000000e-07 : f32
    %33 = vector.broadcast %cst_17 : f32 to vector<16x32xf32>
    %34 = arith.addf %32, %33 : vector<16x32xf32>
    %cst_18 = arith.constant dense<0xFF800000> : vector<32xf32>
    %35 = vector.multi_reduction <maximumf>, %34, %cst_18 [0] : vector<16x32xf32> to vector<32xf32>
    %36 = vector.shape_cast %35 : vector<32xf32> to vector<1x32xf32>
    %c0_i32 = arith.constant 0 : i32
    %37 = arith.cmpi eq, %arg0, %c0_i32 : i32
    %38 = arith.extui %37 : i1 to i32
    %c0_i32_19 = arith.constant 0 : i32
    %39 = arith.cmpi ne, %38, %c0_i32_19 : i32
    scf.if %39 {
      %c0_22 = arith.constant 0 : index
      %c0_23 = arith.constant 0 : index
      %43 = vector.load %arg7[%c0_22, %c0_23] : memref<1x32xf32, #tpu.memory_space<vmem>>, vector<1x32xf32>
      tpu.vector_store %arg7[%c0_22, %c0_23], %36 {strides = array<i32>} : memref<1x32xf32, #tpu.memory_space<vmem>>, vector<1x32xf32>,
    } else {
    }
    %c0_i32_20 = arith.constant 0 : i32
    %40 = arith.cmpi sgt, %arg0, %c0_i32_20 : i32
    %41 = arith.extui %40 : i1 to i32
    %c0_i32_21 = arith.constant 0 : i32
    %42 = arith.cmpi ne, %41, %c0_i32_21 : i32
    scf.if %42 {
      %c0_22 = arith.constant 0 : index
      %c0_23 = arith.constant 0 : index
      %43 = vector.load %arg7[%c0_22, %c0_23] : memref<1x32xf32, #tpu.memory_space<vmem>>, vector<1x32xf32>
      %44 = arith.maximumf %43, %36 : vector<1x32xf32>
      %c0_24 = arith.constant 0 : index
      %c0_25 = arith.constant 0 : index
      %45 = vector.load %arg7[%c0_24, %c0_25] : memref<1x32xf32, #tpu.memory_space<vmem>>, vector<1x32xf32>
      tpu.vector_store %arg7[%c0_24, %c0_25], %44 {strides = array<i32>} : memref<1x32xf32, #tpu.memory_space<vmem>>, vector<1x32xf32>,
    } else {
    }
    return
  }
  func.func @transform_0(%arg0: i32) -> (i32, i32) {
    %c0_i32 = arith.constant 0 : i32
    %c0_i32_0 = arith.constant 0 : i32
    return %arg0, %c0_i32 : i32, i32
  }
  func.func @transform_1(%arg0: i32) -> (i32, i32) {
    %c0_i32 = arith.constant 0 : i32
    %c0_i32_0 = arith.constant 0 : i32
    %c0_i32_1 = arith.constant 0 : i32
    return %c0_i32, %c0_i32_0 : i32, i32
  }
  func.func @transform_2(%arg0: i32) -> (i32, i32) {
    %c0_i32 = arith.constant 0 : i32
    %c0_i32_0 = arith.constant 0 : i32
    %c0_i32_1 = arith.constant 0 : i32
    return %c0_i32, %c0_i32_0 : i32, i32
  }
  func.func @transform_3(%arg0: i32) -> (i32, i32) {
    %c0_i32 = arith.constant 0 : i32
    %c0_i32_0 = arith.constant 0 : i32
    %c0_i32_1 = arith.constant 0 : i32
    return %c0_i32, %c0_i32_0 : i32, i32
  }
  func.func @transform_4(%arg0: i32) -> (i32, i32) {
    %c0_i32 = arith.constant 0 : i32
    %c0_i32_0 = arith.constant 0 : i32
    %c0_i32_1 = arith.constant 0 : i32
    return %c0_i32, %c0_i32_0 : i32, i32
  }
  func.func @transform_5(%arg0: i32) -> (i32, i32) {
    %c0_i32 = arith.constant 0 : i32
    %c0_i32_0 = arith.constant 0 : i32
    return %arg0, %c0_i32 : i32, i32
  }
  func.func @transform_6(%arg0: i32) -> (i32, i32) {
    %c0_i32 = arith.constant 0 : i32
    %c0_i32_0 = arith.constant 0 : i32
    %c0_i32_1 = arith.constant 0 : i32
    return %c0_i32, %c0_i32_0 : i32, i32
  }
}

module attributes {stable_mosaic.version = 11 : i64} {
  func.func @_msg_kernel(%arg0: i32, %arg1: memref<1x1xf32, #tpu.memory_space<smem>>, %arg2: memref<16x64xf32, #tpu.memory_space<vmem>>, %arg3: memref<1x32xf32, #tpu.memory_space<vmem>>, %arg4: memref<16x64xbf16, #tpu.memory_space<vmem>>) attributes {dimension_semantics = [#tpu.dimension_semantics<parallel>], iteration_bounds = array<i64: 1>, scalar_prefetch = 0 : i64, scratch_operands = 0 : i64, tpu.core_type = #tpu.core_type<tc>, window_params = [{transform_indices = @transform_0, window_bounds = array<i64: 1, 1>}, {transform_indices = @transform_1, window_bounds = array<i64: 16, 64>}, {pipeline_mode = #tpu.pipeline_mode<synchronous>, transform_indices = @transform_2, window_bounds = array<i64: 1, 32>}, {transform_indices = @transform_3, window_bounds = array<i64: 16, 64>}]} {
    %c0 = arith.constant 0 : index
    %c0_0 = arith.constant 0 : index
    %0 = memref.load %arg1[%c0, %c0_0] : memref<1x1xf32, #tpu.memory_space<smem>>
    %c0_1 = arith.constant 0 : index
    %c0_2 = arith.constant 0 : index
    %1 = vector.load %arg2[%c0_1, %c0_2] : memref<16x64xf32, #tpu.memory_space<vmem>>, vector<16x64xf32>
    %2 = vector.extract_strided_slice %1 {offsets = [0, 0], sizes = [16, 32], strides = [1, 1]} : vector<16x64xf32> to vector<16x32xf32>
    %cst = arith.constant 0.000000e+00 : f32
    %3 = vector.broadcast %cst : f32 to vector<16x32xf32>
    %4 = arith.maximumf %2, %3 : vector<16x32xf32>
    %cst_3 = arith.constant 1.000000e-07 : f32
    %5 = vector.broadcast %cst_3 : f32 to vector<16x32xf32>
    %6 = arith.addf %4, %5 : vector<16x32xf32>
    %c0_4 = arith.constant 0 : index
    %c0_5 = arith.constant 0 : index
    %7 = vector.load %arg3[%c0_4, %c0_5] : memref<1x32xf32, #tpu.memory_space<vmem>>, vector<1x32xf32>
    %8 = vector.broadcast %7 : vector<1x32xf32> to vector<16x32xf32>
    %9 = arith.subf %6, %8 : vector<16x32xf32>
    %10 = vector.broadcast %0 : f32 to vector<16x32xf32>
    %11 = arith.mulf %10, %9 : vector<16x32xf32>
    %12 = math.exp %11 : vector<16x32xf32>
    %13 = arith.mulf %12, %6 : vector<16x32xf32>
    %14 = arith.truncf %13 : vector<16x32xf32> to vector<16x32xbf16>
    %c0_6 = arith.constant 0 : index
    %c0_7 = arith.constant 0 : index
    %15 = vector.load %arg4[%c0_6, %c0_7] : memref<16x64xbf16, #tpu.memory_space<vmem>>, vector<16x32xbf16>
    tpu.vector_store %arg4[%c0_6, %c0_7], %14 {strides = array<i32>} : memref<16x64xbf16, #tpu.memory_space<vmem>>, vector<16x32xbf16>,
    %16 = arith.truncf %12 : vector<16x32xf32> to vector<16x32xbf16>
    %c0_8 = arith.constant 0 : index
    %c32 = arith.constant 32 : index
    %17 = vector.load %arg4[%c0_8, %c32] : memref<16x64xbf16, #tpu.memory_space<vmem>>, vector<16x32xbf16>
    tpu.vector_store %arg4[%c0_8, %c32], %16 {strides = array<i32>} : memref<16x64xbf16, #tpu.memory_space<vmem>>, vector<16x32xbf16>,
    return
  }
  func.func @transform_0(%arg0: i32) -> (i32, i32) {
    %c0_i32 = arith.constant 0 : i32
    %c0_i32_0 = arith.constant 0 : i32
    %c0_i32_1 = arith.constant 0 : i32
    return %c0_i32, %c0_i32_0 : i32, i32
  }
  func.func @transform_1(%arg0: i32) -> (i32, i32) {
    %c0_i32 = arith.constant 0 : i32
    %c0_i32_0 = arith.constant 0 : i32
    return %arg0, %c0_i32 : i32, i32
  }
  func.func @transform_2(%arg0: i32) -> (i32, i32) {
    %c0_i32 = arith.constant 0 : i32
    %c0_i32_0 = arith.constant 0 : i32
    %c0_i32_1 = arith.constant 0 : i32
    return %c0_i32, %c0_i32_0 : i32, i32
  }
  func.func @transform_3(%arg0: i32) -> (i32, i32) {
    %c0_i32 = arith.constant 0 : i32
    %c0_i32_0 = arith.constant 0 : i32
    return %arg0, %c0_i32 : i32, i32
  }
}

module attributes {stable_mosaic.version = 11 : i64} {
  func.func @_gen_layer_kernel(%arg0: i32, %arg1: i32, %arg2: memref<16x16xbf16, #tpu.memory_space<vmem>>, %arg3: memref<16x64xbf16, #tpu.memory_space<vmem>>, %arg4: memref<16x64xf32, #tpu.memory_space<vmem>>, %arg5: memref<32x64xbf16, #tpu.memory_space<vmem>>, %arg6: memref<1x64xf32, #tpu.memory_space<vmem>>, %arg7: memref<1x64xf32, #tpu.memory_space<vmem>>, %arg8: memref<1x64xf32, #tpu.memory_space<vmem>>, %arg9: memref<64x32xbf16, #tpu.memory_space<vmem>>, %arg10: memref<1x32xf32, #tpu.memory_space<vmem>>, %arg11: memref<1x32xf32, #tpu.memory_space<vmem>>, %arg12: memref<1x32xf32, #tpu.memory_space<vmem>>, %arg13: memref<16x32xf32, #tpu.memory_space<vmem>>, %arg14: memref<16x64xf32, #tpu.memory_space<vmem>>) attributes {dimension_semantics = [#tpu.dimension_semantics<parallel>, #tpu.dimension_semantics<arbitrary>], iteration_bounds = array<i64: 1, 1>, scalar_prefetch = 0 : i64, scratch_operands = 1 : i64, tpu.core_type = #tpu.core_type<tc>, window_params = [{transform_indices = @transform_0, window_bounds = array<i64: 16, 16>}, {transform_indices = @transform_1, window_bounds = array<i64: 16, 64>}, {transform_indices = @transform_2, window_bounds = array<i64: 16, 64>}, {pipeline_mode = #tpu.pipeline_mode<synchronous>, transform_indices = @transform_3, window_bounds = array<i64: 32, 64>}, {pipeline_mode = #tpu.pipeline_mode<synchronous>, transform_indices = @transform_4, window_bounds = array<i64: 1, 64>}, {pipeline_mode = #tpu.pipeline_mode<synchronous>, transform_indices = @transform_5, window_bounds = array<i64: 1, 64>}, {pipeline_mode = #tpu.pipeline_mode<synchronous>, transform_indices = @transform_6, window_bounds = array<i64: 1, 64>}, {pipeline_mode = #tpu.pipeline_mode<synchronous>, transform_indices = @transform_7, window_bounds = array<i64: 64, 32>}, {pipeline_mode = #tpu.pipeline_mode<synchronous>, transform_indices = @transform_8, window_bounds = array<i64: 1, 32>}, {pipeline_mode = #tpu.pipeline_mode<synchronous>, transform_indices = @transform_9, window_bounds = array<i64: 1, 32>}, {pipeline_mode = #tpu.pipeline_mode<synchronous>, transform_indices = @transform_10, window_bounds = array<i64: 1, 32>}, {transform_indices = @transform_11, window_bounds = array<i64: 16, 32>}]} {
    %c0_i32 = arith.constant 0 : i32
    %0 = arith.cmpi eq, %arg1, %c0_i32 : i32
    %1 = arith.extui %0 : i1 to i32
    %c0_i32_0 = arith.constant 0 : i32
    %2 = arith.cmpi ne, %1, %c0_i32_0 : i32
    scf.if %2 {
      %cst_10 = arith.constant 0.000000e+00 : f32
      %12 = vector.broadcast %cst_10 : f32 to vector<16x64xf32>
      %c0_11 = arith.constant 0 : index
      %c0_12 = arith.constant 0 : index
      %13 = vector.load %arg14[%c0_11, %c0_12] : memref<16x64xf32, #tpu.memory_space<vmem>>, vector<16x64xf32>
      tpu.vector_store %arg14[%c0_11, %c0_12], %12 {strides = array<i32>} : memref<16x64xf32, #tpu.memory_space<vmem>>, vector<16x64xf32>,
    } else {
    }
    %c0 = arith.constant 0 : index
    %c0_1 = arith.constant 0 : index
    %3 = vector.load %arg14[%c0, %c0_1] : memref<16x64xf32, #tpu.memory_space<vmem>>, vector<16x64xf32>
    %c0_2 = arith.constant 0 : index
    %c0_3 = arith.constant 0 : index
    %4 = vector.load %arg2[%c0_2, %c0_3] : memref<16x16xbf16, #tpu.memory_space<vmem>>, vector<16x16xbf16>
    %c0_4 = arith.constant 0 : index
    %c0_5 = arith.constant 0 : index
    %5 = vector.load %arg3[%c0_4, %c0_5] : memref<16x64xbf16, #tpu.memory_space<vmem>>, vector<16x64xbf16>
    %cst = arith.constant dense<0.000000e+00> : vector<16x64xf32>
    %6 = tpu.matmul %4, %5, %cst {dimension_numbers = #tpu.dot_dimension_numbers<[1], [0], [0], [1], [0, 0, 1, 1], [], []>} : vector<16x16xbf16>, vector<16x64xbf16>, vector<16x64xf32> -> vector<16x64xf32>
    %7 = arith.addf %3, %6 : vector<16x64xf32>
    %c0_6 = arith.constant 0 : index
    %c0_7 = arith.constant 0 : index
    %8 = vector.load %arg14[%c0_6, %c0_7] : memref<16x64xf32, #tpu.memory_space<vmem>>, vector<16x64xf32>
    tpu.vector_store %arg14[%c0_6, %c0_7], %7 {strides = array<i32>} : memref<16x64xf32, #tpu.memory_space<vmem>>, vector<16x64xf32>,
    %c0_i32_8 = arith.constant 0 : i32
    %9 = arith.cmpi eq, %arg1, %c0_i32_8 : i32
    %10 = arith.extui %9 : i1 to i32
    %c0_i32_9 = arith.constant 0 : i32
    %11 = arith.cmpi ne, %10, %c0_i32_9 : i32
    scf.if %11 {
      %c0_10 = arith.constant 0 : index
      %c0_11 = arith.constant 0 : index
      %12 = vector.load %arg14[%c0_10, %c0_11] : memref<16x64xf32, #tpu.memory_space<vmem>>, vector<16x64xf32>
      %13 = vector.extract_strided_slice %12 {offsets = [0, 0], sizes = [16, 32], strides = [1, 1]} : vector<16x64xf32> to vector<16x32xf32>
      %14 = vector.extract_strided_slice %12 {offsets = [0, 32], sizes = [16, 32], strides = [1, 1]} : vector<16x64xf32> to vector<16x32xf32>
      %c0_12 = arith.constant 0 : index
      %c0_13 = arith.constant 0 : index
      %15 = vector.load %arg4[%c0_12, %c0_13] : memref<16x64xf32, #tpu.memory_space<vmem>>, vector<16x64xf32>
      %16 = vector.extract_strided_slice %15 {offsets = [0, 32], sizes = [16, 32], strides = [1, 1]} : vector<16x64xf32> to vector<16x32xf32>
      %cst_14 = arith.constant 9.99999996E-13 : f32
      %17 = vector.broadcast %cst_14 : f32 to vector<16x32xf32>
      %18 = arith.maximumf %14, %17 : vector<16x32xf32>
      %19 = tpu.reciprocal %18 {approx = true} : vector<16x32xf32> -> vector<16x32xf32>
      %20 = arith.mulf %13, %19 : vector<16x32xf32>
      %21 = arith.addf %20, %16 : vector<16x32xf32>
      %22 = arith.truncf %21 : vector<16x32xf32> to vector<16x32xbf16>
      %c0_15 = arith.constant 0 : index
      %c0_16 = arith.constant 0 : index
      %23 = vector.load %arg5[%c0_15, %c0_16] : memref<32x64xbf16, #tpu.memory_space<vmem>>, vector<32x64xbf16>
      %cst_17 = arith.constant dense<0.000000e+00> : vector<16x64xf32>
      %24 = tpu.matmul %22, %23, %cst_17 {dimension_numbers = #tpu.dot_dimension_numbers<[1], [0], [0], [1], [0, 0, 1, 1], [], []>} : vector<16x32xbf16>, vector<32x64xbf16>, vector<16x64xf32> -> vector<16x64xf32>
      %c0_18 = arith.constant 0 : index
      %c0_19 = arith.constant 0 : index
      %25 = vector.load %arg6[%c0_18, %c0_19] : memref<1x64xf32, #tpu.memory_space<vmem>>, vector<1x64xf32>
      %26 = vector.broadcast %25 : vector<1x64xf32> to vector<16x64xf32>
      %27 = arith.addf %24, %26 : vector<16x64xf32>
      %c0_20 = arith.constant 0 : index
      %c0_21 = arith.constant 0 : index
      %28 = vector.load %arg7[%c0_20, %c0_21] : memref<1x64xf32, #tpu.memory_space<vmem>>, vector<1x64xf32>
      %c0_22 = arith.constant 0 : index
      %c0_23 = arith.constant 0 : index
      %29 = vector.load %arg8[%c0_22, %c0_23] : memref<1x64xf32, #tpu.memory_space<vmem>>, vector<1x64xf32>
      %cst_24 = arith.constant dense<0.000000e+00> : vector<16xf32>
      %30 = vector.multi_reduction <add>, %27, %cst_24 [1] : vector<16x64xf32> to vector<16xf32>
      %31 = vector.shape_cast %30 : vector<16xf32> to vector<16x1xf32>
      %cst_25 = arith.constant 6.400000e+01 : f32
      %32 = vector.broadcast %cst_25 : f32 to vector<16x1xf32>
      %33 = arith.divf %31, %32 : vector<16x1xf32>
      %34 = vector.broadcast %33 : vector<16x1xf32> to vector<16x64xf32>
      %35 = arith.subf %27, %34 : vector<16x64xf32>
      %36 = arith.mulf %35, %35 : vector<16x64xf32>
      %cst_26 = arith.constant dense<0.000000e+00> : vector<16xf32>
      %37 = vector.multi_reduction <add>, %36, %cst_26 [1] : vector<16x64xf32> to vector<16xf32>
      %38 = vector.shape_cast %37 : vector<16xf32> to vector<16x1xf32>
      %cst_27 = arith.constant 6.400000e+01 : f32
      %39 = vector.broadcast %cst_27 : f32 to vector<16x1xf32>
      %40 = arith.divf %38, %39 : vector<16x1xf32>
      %cst_28 = arith.constant 9.99999974E-6 : f32
      %41 = vector.broadcast %cst_28 : f32 to vector<16x1xf32>
      %42 = arith.addf %40, %41 : vector<16x1xf32>
      %43 = math.rsqrt %42 : vector<16x1xf32>
      %44 = vector.broadcast %43 : vector<16x1xf32> to vector<16x64xf32>
      %45 = arith.mulf %35, %44 : vector<16x64xf32>
      %46 = vector.broadcast %28 : vector<1x64xf32> to vector<16x64xf32>
      %47 = arith.mulf %45, %46 : vector<16x64xf32>
      %48 = vector.broadcast %29 : vector<1x64xf32> to vector<16x64xf32>
      %49 = arith.addf %47, %48 : vector<16x64xf32>
      %cst_29 = arith.constant 0.000000e+00 : f32
      %50 = vector.broadcast %cst_29 : f32 to vector<16x64xf32>
      %51 = arith.maximumf %49, %50 : vector<16x64xf32>
      %52 = arith.truncf %51 : vector<16x64xf32> to vector<16x64xbf16>
      %c0_30 = arith.constant 0 : index
      %c0_31 = arith.constant 0 : index
      %53 = vector.load %arg9[%c0_30, %c0_31] : memref<64x32xbf16, #tpu.memory_space<vmem>>, vector<64x32xbf16>
      %cst_32 = arith.constant dense<0.000000e+00> : vector<16x32xf32>
      %54 = tpu.matmul %52, %53, %cst_32 {dimension_numbers = #tpu.dot_dimension_numbers<[1], [0], [0], [1], [0, 0, 1, 1], [], []>} : vector<16x64xbf16>, vector<64x32xbf16>, vector<16x32xf32> -> vector<16x32xf32>
      %c0_33 = arith.constant 0 : index
      %c0_34 = arith.constant 0 : index
      %55 = vector.load %arg10[%c0_33, %c0_34] : memref<1x32xf32, #tpu.memory_space<vmem>>, vector<1x32xf32>
      %56 = vector.broadcast %55 : vector<1x32xf32> to vector<16x32xf32>
      %57 = arith.addf %54, %56 : vector<16x32xf32>
      %c0_35 = arith.constant 0 : index
      %c0_36 = arith.constant 0 : index
      %58 = vector.load %arg11[%c0_35, %c0_36] : memref<1x32xf32, #tpu.memory_space<vmem>>, vector<1x32xf32>
      %c0_37 = arith.constant 0 : index
      %c0_38 = arith.constant 0 : index
      %59 = vector.load %arg12[%c0_37, %c0_38] : memref<1x32xf32, #tpu.memory_space<vmem>>, vector<1x32xf32>
      %cst_39 = arith.constant dense<0.000000e+00> : vector<16xf32>
      %60 = vector.multi_reduction <add>, %57, %cst_39 [1] : vector<16x32xf32> to vector<16xf32>
      %61 = vector.shape_cast %60 : vector<16xf32> to vector<16x1xf32>
      %cst_40 = arith.constant 3.200000e+01 : f32
      %62 = vector.broadcast %cst_40 : f32 to vector<16x1xf32>
      %63 = arith.divf %61, %62 : vector<16x1xf32>
      %64 = vector.broadcast %63 : vector<16x1xf32> to vector<16x32xf32>
      %65 = arith.subf %57, %64 : vector<16x32xf32>
      %66 = arith.mulf %65, %65 : vector<16x32xf32>
      %cst_41 = arith.constant dense<0.000000e+00> : vector<16xf32>
      %67 = vector.multi_reduction <add>, %66, %cst_41 [1] : vector<16x32xf32> to vector<16xf32>
      %68 = vector.shape_cast %67 : vector<16xf32> to vector<16x1xf32>
      %cst_42 = arith.constant 3.200000e+01 : f32
      %69 = vector.broadcast %cst_42 : f32 to vector<16x1xf32>
      %70 = arith.divf %68, %69 : vector<16x1xf32>
      %cst_43 = arith.constant 9.99999974E-6 : f32
      %71 = vector.broadcast %cst_43 : f32 to vector<16x1xf32>
      %72 = arith.addf %70, %71 : vector<16x1xf32>
      %73 = math.rsqrt %72 : vector<16x1xf32>
      %74 = vector.broadcast %73 : vector<16x1xf32> to vector<16x32xf32>
      %75 = arith.mulf %65, %74 : vector<16x32xf32>
      %76 = vector.broadcast %58 : vector<1x32xf32> to vector<16x32xf32>
      %77 = arith.mulf %75, %76 : vector<16x32xf32>
      %78 = vector.broadcast %59 : vector<1x32xf32> to vector<16x32xf32>
      %79 = arith.addf %77, %78 : vector<16x32xf32>
      %cst_44 = arith.constant 0.000000e+00 : f32
      %80 = vector.broadcast %cst_44 : f32 to vector<16x32xf32>
      %81 = arith.maximumf %79, %80 : vector<16x32xf32>
      %c0_45 = arith.constant 0 : index
      %c0_46 = arith.constant 0 : index
      %82 = vector.load %arg13[%c0_45, %c0_46] : memref<16x32xf32, #tpu.memory_space<vmem>>, vector<16x32xf32>
      tpu.vector_store %arg13[%c0_45, %c0_46], %81 {strides = array<i32>} : memref<16x32xf32, #tpu.memory_space<vmem>>, vector<16x32xf32>,
    } else {
    }
    return
  }
  func.func @transform_0(%arg0: i32, %arg1: i32) -> (i32, i32) {
    %c0_i32 = arith.constant 0 : i32
    return %arg0, %arg1 : i32, i32
  }
  func.func @transform_1(%arg0: i32, %arg1: i32) -> (i32, i32) {
    %c0_i32 = arith.constant 0 : i32
    %c0_i32_0 = arith.constant 0 : i32
    return %arg1, %c0_i32 : i32, i32
  }
  func.func @transform_2(%arg0: i32, %arg1: i32) -> (i32, i32) {
    %c0_i32 = arith.constant 0 : i32
    %c0_i32_0 = arith.constant 0 : i32
    return %arg0, %c0_i32 : i32, i32
  }
  func.func @transform_3(%arg0: i32, %arg1: i32) -> (i32, i32) {
    %c0_i32 = arith.constant 0 : i32
    %c0_i32_0 = arith.constant 0 : i32
    %c0_i32_1 = arith.constant 0 : i32
    return %c0_i32, %c0_i32_0 : i32, i32
  }
  func.func @transform_4(%arg0: i32, %arg1: i32) -> (i32, i32) {
    %c0_i32 = arith.constant 0 : i32
    %c0_i32_0 = arith.constant 0 : i32
    %c0_i32_1 = arith.constant 0 : i32
    return %c0_i32, %c0_i32_0 : i32, i32
  }
  func.func @transform_5(%arg0: i32, %arg1: i32) -> (i32, i32) {
    %c0_i32 = arith.constant 0 : i32
    %c0_i32_0 = arith.constant 0 : i32
    %c0_i32_1 = arith.constant 0 : i32
    return %c0_i32, %c0_i32_0 : i32, i32
  }
  func.func @transform_6(%arg0: i32, %arg1: i32) -> (i32, i32) {
    %c0_i32 = arith.constant 0 : i32
    %c0_i32_0 = arith.constant 0 : i32
    %c0_i32_1 = arith.constant 0 : i32
    return %c0_i32, %c0_i32_0 : i32, i32
  }
  func.func @transform_7(%arg0: i32, %arg1: i32) -> (i32, i32) {
    %c0_i32 = arith.constant 0 : i32
    %c0_i32_0 = arith.constant 0 : i32
    %c0_i32_1 = arith.constant 0 : i32
    return %c0_i32, %c0_i32_0 : i32, i32
  }
  func.func @transform_8(%arg0: i32, %arg1: i32) -> (i32, i32) {
    %c0_i32 = arith.constant 0 : i32
    %c0_i32_0 = arith.constant 0 : i32
    %c0_i32_1 = arith.constant 0 : i32
    return %c0_i32, %c0_i32_0 : i32, i32
  }
  func.func @transform_9(%arg0: i32, %arg1: i32) -> (i32, i32) {
    %c0_i32 = arith.constant 0 : i32
    %c0_i32_0 = arith.constant 0 : i32
    %c0_i32_1 = arith.constant 0 : i32
    return %c0_i32, %c0_i32_0 : i32, i32
  }
  func.func @transform_10(%arg0: i32, %arg1: i32) -> (i32, i32) {
    %c0_i32 = arith.constant 0 : i32
    %c0_i32_0 = arith.constant 0 : i32
    %c0_i32_1 = arith.constant 0 : i32
    return %c0_i32, %c0_i32_0 : i32, i32
  }
  func.func @transform_11(%arg0: i32, %arg1: i32) -> (i32, i32) {
    %c0_i32 = arith.constant 0 : i32
    %c0_i32_0 = arith.constant 0 : i32
    return %arg0, %c0_i32 : i32, i32
  }
}

module attributes {stable_mosaic.version = 11 : i64} {
  func.func @_chan_max_kernel(%arg0: i32, %arg1: memref<16x32xf32, #tpu.memory_space<vmem>>, %arg2: memref<1x32xf32, #tpu.memory_space<vmem>>) attributes {dimension_semantics = [#tpu.dimension_semantics<arbitrary>], iteration_bounds = array<i64: 1>, scalar_prefetch = 0 : i64, scratch_operands = 0 : i64, tpu.core_type = #tpu.core_type<tc>, window_params = [{transform_indices = @transform_0, window_bounds = array<i64: 16, 32>}, {pipeline_mode = #tpu.pipeline_mode<synchronous>, transform_indices = @transform_1, window_bounds = array<i64: 1, 32>}]} {
    %c0 = arith.constant 0 : index
    %c0_0 = arith.constant 0 : index
    %0 = vector.load %arg1[%c0, %c0_0] : memref<16x32xf32, #tpu.memory_space<vmem>>, vector<16x32xf32>
    %cst = arith.constant 0.000000e+00 : f32
    %1 = vector.broadcast %cst : f32 to vector<16x32xf32>
    %2 = arith.maximumf %0, %1 : vector<16x32xf32>
    %cst_1 = arith.constant 1.000000e-07 : f32
    %3 = vector.broadcast %cst_1 : f32 to vector<16x32xf32>
    %4 = arith.addf %2, %3 : vector<16x32xf32>
    %cst_2 = arith.constant dense<0xFF800000> : vector<32xf32>
    %5 = vector.multi_reduction <maximumf>, %4, %cst_2 [0] : vector<16x32xf32> to vector<32xf32>
    %6 = vector.shape_cast %5 : vector<32xf32> to vector<1x32xf32>
    %c0_i32 = arith.constant 0 : i32
    %7 = arith.cmpi eq, %arg0, %c0_i32 : i32
    %8 = arith.extui %7 : i1 to i32
    %c0_i32_3 = arith.constant 0 : i32
    %9 = arith.cmpi ne, %8, %c0_i32_3 : i32
    scf.if %9 {
      %c0_6 = arith.constant 0 : index
      %c0_7 = arith.constant 0 : index
      %13 = vector.load %arg2[%c0_6, %c0_7] : memref<1x32xf32, #tpu.memory_space<vmem>>, vector<1x32xf32>
      tpu.vector_store %arg2[%c0_6, %c0_7], %6 {strides = array<i32>} : memref<1x32xf32, #tpu.memory_space<vmem>>, vector<1x32xf32>,
    } else {
    }
    %c0_i32_4 = arith.constant 0 : i32
    %10 = arith.cmpi sgt, %arg0, %c0_i32_4 : i32
    %11 = arith.extui %10 : i1 to i32
    %c0_i32_5 = arith.constant 0 : i32
    %12 = arith.cmpi ne, %11, %c0_i32_5 : i32
    scf.if %12 {
      %c0_6 = arith.constant 0 : index
      %c0_7 = arith.constant 0 : index
      %13 = vector.load %arg2[%c0_6, %c0_7] : memref<1x32xf32, #tpu.memory_space<vmem>>, vector<1x32xf32>
      %14 = arith.maximumf %13, %6 : vector<1x32xf32>
      %c0_8 = arith.constant 0 : index
      %c0_9 = arith.constant 0 : index
      %15 = vector.load %arg2[%c0_8, %c0_9] : memref<1x32xf32, #tpu.memory_space<vmem>>, vector<1x32xf32>
      tpu.vector_store %arg2[%c0_8, %c0_9], %14 {strides = array<i32>} : memref<1x32xf32, #tpu.memory_space<vmem>>, vector<1x32xf32>,
    } else {
    }
    return
  }
  func.func @transform_0(%arg0: i32) -> (i32, i32) {
    %c0_i32 = arith.constant 0 : i32
    %c0_i32_0 = arith.constant 0 : i32
    return %arg0, %c0_i32 : i32, i32
  }
  func.func @transform_1(%arg0: i32) -> (i32, i32) {
    %c0_i32 = arith.constant 0 : i32
    %c0_i32_0 = arith.constant 0 : i32
    %c0_i32_1 = arith.constant 0 : i32
    return %c0_i32, %c0_i32_0 : i32, i32
  }
}

module attributes {stable_mosaic.version = 11 : i64} {
  func.func @_gen_layer_kernel(%arg0: i32, %arg1: i32, %arg2: memref<16x16xbf16, #tpu.memory_space<vmem>>, %arg3: memref<16x64xbf16, #tpu.memory_space<vmem>>, %arg4: memref<16x32xf32, #tpu.memory_space<vmem>>, %arg5: memref<32x64xbf16, #tpu.memory_space<vmem>>, %arg6: memref<1x64xf32, #tpu.memory_space<vmem>>, %arg7: memref<1x64xf32, #tpu.memory_space<vmem>>, %arg8: memref<1x64xf32, #tpu.memory_space<vmem>>, %arg9: memref<64x32xbf16, #tpu.memory_space<vmem>>, %arg10: memref<1x32xf32, #tpu.memory_space<vmem>>, %arg11: memref<1x32xf32, #tpu.memory_space<vmem>>, %arg12: memref<1x32xf32, #tpu.memory_space<vmem>>, %arg13: memref<32x32xbf16, #tpu.memory_space<vmem>>, %arg14: memref<1x32xf32, #tpu.memory_space<vmem>>, %arg15: memref<32x128xbf16, #tpu.memory_space<vmem>>, %arg16: memref<1x128xf32, #tpu.memory_space<vmem>>, %arg17: memref<16x128xf32, #tpu.memory_space<vmem>>, %arg18: memref<16x64xf32, #tpu.memory_space<vmem>>) attributes {dimension_semantics = [#tpu.dimension_semantics<parallel>, #tpu.dimension_semantics<arbitrary>], iteration_bounds = array<i64: 1, 1>, scalar_prefetch = 0 : i64, scratch_operands = 1 : i64, tpu.core_type = #tpu.core_type<tc>, window_params = [{transform_indices = @transform_0, window_bounds = array<i64: 16, 16>}, {transform_indices = @transform_1, window_bounds = array<i64: 16, 64>}, {transform_indices = @transform_2, window_bounds = array<i64: 16, 32>}, {pipeline_mode = #tpu.pipeline_mode<synchronous>, transform_indices = @transform_3, window_bounds = array<i64: 32, 64>}, {pipeline_mode = #tpu.pipeline_mode<synchronous>, transform_indices = @transform_4, window_bounds = array<i64: 1, 64>}, {pipeline_mode = #tpu.pipeline_mode<synchronous>, transform_indices = @transform_5, window_bounds = array<i64: 1, 64>}, {pipeline_mode = #tpu.pipeline_mode<synchronous>, transform_indices = @transform_6, window_bounds = array<i64: 1, 64>}, {pipeline_mode = #tpu.pipeline_mode<synchronous>, transform_indices = @transform_7, window_bounds = array<i64: 64, 32>}, {pipeline_mode = #tpu.pipeline_mode<synchronous>, transform_indices = @transform_8, window_bounds = array<i64: 1, 32>}, {pipeline_mode = #tpu.pipeline_mode<synchronous>, transform_indices = @transform_9, window_bounds = array<i64: 1, 32>}, {pipeline_mode = #tpu.pipeline_mode<synchronous>, transform_indices = @transform_10, window_bounds = array<i64: 1, 32>}, {pipeline_mode = #tpu.pipeline_mode<synchronous>, transform_indices = @transform_11, window_bounds = array<i64: 32, 32>}, {pipeline_mode = #tpu.pipeline_mode<synchronous>, transform_indices = @transform_12, window_bounds = array<i64: 1, 32>}, {pipeline_mode = #tpu.pipeline_mode<synchronous>, transform_indices = @transform_13, window_bounds = array<i64: 32, 128>}, {pipeline_mode = #tpu.pipeline_mode<synchronous>, transform_indices = @transform_14, window_bounds = array<i64: 1, 128>}, {transform_indices = @transform_15, window_bounds = array<i64: 16, 128>}]} {
    %c0_i32 = arith.constant 0 : i32
    %0 = arith.cmpi eq, %arg1, %c0_i32 : i32
    %1 = arith.extui %0 : i1 to i32
    %c0_i32_0 = arith.constant 0 : i32
    %2 = arith.cmpi ne, %1, %c0_i32_0 : i32
    scf.if %2 {
      %cst_10 = arith.constant 0.000000e+00 : f32
      %12 = vector.broadcast %cst_10 : f32 to vector<16x64xf32>
      %c0_11 = arith.constant 0 : index
      %c0_12 = arith.constant 0 : index
      %13 = vector.load %arg18[%c0_11, %c0_12] : memref<16x64xf32, #tpu.memory_space<vmem>>, vector<16x64xf32>
      tpu.vector_store %arg18[%c0_11, %c0_12], %12 {strides = array<i32>} : memref<16x64xf32, #tpu.memory_space<vmem>>, vector<16x64xf32>,
    } else {
    }
    %c0 = arith.constant 0 : index
    %c0_1 = arith.constant 0 : index
    %3 = vector.load %arg18[%c0, %c0_1] : memref<16x64xf32, #tpu.memory_space<vmem>>, vector<16x64xf32>
    %c0_2 = arith.constant 0 : index
    %c0_3 = arith.constant 0 : index
    %4 = vector.load %arg2[%c0_2, %c0_3] : memref<16x16xbf16, #tpu.memory_space<vmem>>, vector<16x16xbf16>
    %c0_4 = arith.constant 0 : index
    %c0_5 = arith.constant 0 : index
    %5 = vector.load %arg3[%c0_4, %c0_5] : memref<16x64xbf16, #tpu.memory_space<vmem>>, vector<16x64xbf16>
    %cst = arith.constant dense<0.000000e+00> : vector<16x64xf32>
    %6 = tpu.matmul %4, %5, %cst {dimension_numbers = #tpu.dot_dimension_numbers<[1], [0], [0], [1], [0, 0, 1, 1], [], []>} : vector<16x16xbf16>, vector<16x64xbf16>, vector<16x64xf32> -> vector<16x64xf32>
    %7 = arith.addf %3, %6 : vector<16x64xf32>
    %c0_6 = arith.constant 0 : index
    %c0_7 = arith.constant 0 : index
    %8 = vector.load %arg18[%c0_6, %c0_7] : memref<16x64xf32, #tpu.memory_space<vmem>>, vector<16x64xf32>
    tpu.vector_store %arg18[%c0_6, %c0_7], %7 {strides = array<i32>} : memref<16x64xf32, #tpu.memory_space<vmem>>, vector<16x64xf32>,
    %c0_i32_8 = arith.constant 0 : i32
    %9 = arith.cmpi eq, %arg1, %c0_i32_8 : i32
    %10 = arith.extui %9 : i1 to i32
    %c0_i32_9 = arith.constant 0 : i32
    %11 = arith.cmpi ne, %10, %c0_i32_9 : i32
    scf.if %11 {
      %c0_10 = arith.constant 0 : index
      %c0_11 = arith.constant 0 : index
      %12 = vector.load %arg18[%c0_10, %c0_11] : memref<16x64xf32, #tpu.memory_space<vmem>>, vector<16x64xf32>
      %13 = vector.extract_strided_slice %12 {offsets = [0, 0], sizes = [16, 32], strides = [1, 1]} : vector<16x64xf32> to vector<16x32xf32>
      %14 = vector.extract_strided_slice %12 {offsets = [0, 32], sizes = [16, 32], strides = [1, 1]} : vector<16x64xf32> to vector<16x32xf32>
      %c0_12 = arith.constant 0 : index
      %c0_13 = arith.constant 0 : index
      %15 = vector.load %arg4[%c0_12, %c0_13] : memref<16x32xf32, #tpu.memory_space<vmem>>, vector<16x32xf32>
      %cst_14 = arith.constant 9.99999996E-13 : f32
      %16 = vector.broadcast %cst_14 : f32 to vector<16x32xf32>
      %17 = arith.maximumf %14, %16 : vector<16x32xf32>
      %18 = tpu.reciprocal %17 {approx = true} : vector<16x32xf32> -> vector<16x32xf32>
      %19 = arith.mulf %13, %18 : vector<16x32xf32>
      %20 = arith.addf %19, %15 : vector<16x32xf32>
      %21 = arith.truncf %20 : vector<16x32xf32> to vector<16x32xbf16>
      %c0_15 = arith.constant 0 : index
      %c0_16 = arith.constant 0 : index
      %22 = vector.load %arg5[%c0_15, %c0_16] : memref<32x64xbf16, #tpu.memory_space<vmem>>, vector<32x64xbf16>
      %cst_17 = arith.constant dense<0.000000e+00> : vector<16x64xf32>
      %23 = tpu.matmul %21, %22, %cst_17 {dimension_numbers = #tpu.dot_dimension_numbers<[1], [0], [0], [1], [0, 0, 1, 1], [], []>} : vector<16x32xbf16>, vector<32x64xbf16>, vector<16x64xf32> -> vector<16x64xf32>
      %c0_18 = arith.constant 0 : index
      %c0_19 = arith.constant 0 : index
      %24 = vector.load %arg6[%c0_18, %c0_19] : memref<1x64xf32, #tpu.memory_space<vmem>>, vector<1x64xf32>
      %25 = vector.broadcast %24 : vector<1x64xf32> to vector<16x64xf32>
      %26 = arith.addf %23, %25 : vector<16x64xf32>
      %c0_20 = arith.constant 0 : index
      %c0_21 = arith.constant 0 : index
      %27 = vector.load %arg7[%c0_20, %c0_21] : memref<1x64xf32, #tpu.memory_space<vmem>>, vector<1x64xf32>
      %c0_22 = arith.constant 0 : index
      %c0_23 = arith.constant 0 : index
      %28 = vector.load %arg8[%c0_22, %c0_23] : memref<1x64xf32, #tpu.memory_space<vmem>>, vector<1x64xf32>
      %cst_24 = arith.constant dense<0.000000e+00> : vector<16xf32>
      %29 = vector.multi_reduction <add>, %26, %cst_24 [1] : vector<16x64xf32> to vector<16xf32>
      %30 = vector.shape_cast %29 : vector<16xf32> to vector<16x1xf32>
      %cst_25 = arith.constant 6.400000e+01 : f32
      %31 = vector.broadcast %cst_25 : f32 to vector<16x1xf32>
      %32 = arith.divf %30, %31 : vector<16x1xf32>
      %33 = vector.broadcast %32 : vector<16x1xf32> to vector<16x64xf32>
      %34 = arith.subf %26, %33 : vector<16x64xf32>
      %35 = arith.mulf %34, %34 : vector<16x64xf32>
      %cst_26 = arith.constant dense<0.000000e+00> : vector<16xf32>
      %36 = vector.multi_reduction <add>, %35, %cst_26 [1] : vector<16x64xf32> to vector<16xf32>
      %37 = vector.shape_cast %36 : vector<16xf32> to vector<16x1xf32>
      %cst_27 = arith.constant 6.400000e+01 : f32
      %38 = vector.broadcast %cst_27 : f32 to vector<16x1xf32>
      %39 = arith.divf %37, %38 : vector<16x1xf32>
      %cst_28 = arith.constant 9.99999974E-6 : f32
      %40 = vector.broadcast %cst_28 : f32 to vector<16x1xf32>
      %41 = arith.addf %39, %40 : vector<16x1xf32>
      %42 = math.rsqrt %41 : vector<16x1xf32>
      %43 = vector.broadcast %42 : vector<16x1xf32> to vector<16x64xf32>
      %44 = arith.mulf %34, %43 : vector<16x64xf32>
      %45 = vector.broadcast %27 : vector<1x64xf32> to vector<16x64xf32>
      %46 = arith.mulf %44, %45 : vector<16x64xf32>
      %47 = vector.broadcast %28 : vector<1x64xf32> to vector<16x64xf32>
      %48 = arith.addf %46, %47 : vector<16x64xf32>
      %cst_29 = arith.constant 0.000000e+00 : f32
      %49 = vector.broadcast %cst_29 : f32 to vector<16x64xf32>
      %50 = arith.maximumf %48, %49 : vector<16x64xf32>
      %51 = arith.truncf %50 : vector<16x64xf32> to vector<16x64xbf16>
      %c0_30 = arith.constant 0 : index
      %c0_31 = arith.constant 0 : index
      %52 = vector.load %arg9[%c0_30, %c0_31] : memref<64x32xbf16, #tpu.memory_space<vmem>>, vector<64x32xbf16>
      %cst_32 = arith.constant dense<0.000000e+00> : vector<16x32xf32>
      %53 = tpu.matmul %51, %52, %cst_32 {dimension_numbers = #tpu.dot_dimension_numbers<[1], [0], [0], [1], [0, 0, 1, 1], [], []>} : vector<16x64xbf16>, vector<64x32xbf16>, vector<16x32xf32> -> vector<16x32xf32>
      %c0_33 = arith.constant 0 : index
      %c0_34 = arith.constant 0 : index
      %54 = vector.load %arg10[%c0_33, %c0_34] : memref<1x32xf32, #tpu.memory_space<vmem>>, vector<1x32xf32>
      %55 = vector.broadcast %54 : vector<1x32xf32> to vector<16x32xf32>
      %56 = arith.addf %53, %55 : vector<16x32xf32>
      %c0_35 = arith.constant 0 : index
      %c0_36 = arith.constant 0 : index
      %57 = vector.load %arg11[%c0_35, %c0_36] : memref<1x32xf32, #tpu.memory_space<vmem>>, vector<1x32xf32>
      %c0_37 = arith.constant 0 : index
      %c0_38 = arith.constant 0 : index
      %58 = vector.load %arg12[%c0_37, %c0_38] : memref<1x32xf32, #tpu.memory_space<vmem>>, vector<1x32xf32>
      %cst_39 = arith.constant dense<0.000000e+00> : vector<16xf32>
      %59 = vector.multi_reduction <add>, %56, %cst_39 [1] : vector<16x32xf32> to vector<16xf32>
      %60 = vector.shape_cast %59 : vector<16xf32> to vector<16x1xf32>
      %cst_40 = arith.constant 3.200000e+01 : f32
      %61 = vector.broadcast %cst_40 : f32 to vector<16x1xf32>
      %62 = arith.divf %60, %61 : vector<16x1xf32>
      %63 = vector.broadcast %62 : vector<16x1xf32> to vector<16x32xf32>
      %64 = arith.subf %56, %63 : vector<16x32xf32>
      %65 = arith.mulf %64, %64 : vector<16x32xf32>
      %cst_41 = arith.constant dense<0.000000e+00> : vector<16xf32>
      %66 = vector.multi_reduction <add>, %65, %cst_41 [1] : vector<16x32xf32> to vector<16xf32>
      %67 = vector.shape_cast %66 : vector<16xf32> to vector<16x1xf32>
      %cst_42 = arith.constant 3.200000e+01 : f32
      %68 = vector.broadcast %cst_42 : f32 to vector<16x1xf32>
      %69 = arith.divf %67, %68 : vector<16x1xf32>
      %cst_43 = arith.constant 9.99999974E-6 : f32
      %70 = vector.broadcast %cst_43 : f32 to vector<16x1xf32>
      %71 = arith.addf %69, %70 : vector<16x1xf32>
      %72 = math.rsqrt %71 : vector<16x1xf32>
      %73 = vector.broadcast %72 : vector<16x1xf32> to vector<16x32xf32>
      %74 = arith.mulf %64, %73 : vector<16x32xf32>
      %75 = vector.broadcast %57 : vector<1x32xf32> to vector<16x32xf32>
      %76 = arith.mulf %74, %75 : vector<16x32xf32>
      %77 = vector.broadcast %58 : vector<1x32xf32> to vector<16x32xf32>
      %78 = arith.addf %76, %77 : vector<16x32xf32>
      %79 = arith.truncf %78 : vector<16x32xf32> to vector<16x32xbf16>
      %c0_44 = arith.constant 0 : index
      %c0_45 = arith.constant 0 : index
      %80 = vector.load %arg13[%c0_44, %c0_45] : memref<32x32xbf16, #tpu.memory_space<vmem>>, vector<32x32xbf16>
      %cst_46 = arith.constant dense<0.000000e+00> : vector<16x32xf32>
      %81 = tpu.matmul %79, %80, %cst_46 {dimension_numbers = #tpu.dot_dimension_numbers<[1], [0], [0], [1], [0, 0, 1, 1], [], []>} : vector<16x32xbf16>, vector<32x32xbf16>, vector<16x32xf32> -> vector<16x32xf32>
      %c0_47 = arith.constant 0 : index
      %c0_48 = arith.constant 0 : index
      %82 = vector.load %arg14[%c0_47, %c0_48] : memref<1x32xf32, #tpu.memory_space<vmem>>, vector<1x32xf32>
      %83 = vector.broadcast %82 : vector<1x32xf32> to vector<16x32xf32>
      %84 = arith.addf %81, %83 : vector<16x32xf32>
      %cst_49 = arith.constant 0.000000e+00 : f32
      %85 = vector.broadcast %cst_49 : f32 to vector<16x32xf32>
      %86 = arith.maximumf %84, %85 : vector<16x32xf32>
      %87 = arith.truncf %86 : vector<16x32xf32> to vector<16x32xbf16>
      %c0_50 = arith.constant 0 : index
      %c0_51 = arith.constant 0 : index
      %88 = vector.load %arg15[%c0_50, %c0_51] : memref<32x128xbf16, #tpu.memory_space<vmem>>, vector<32x128xbf16>
      %cst_52 = arith.constant dense<0.000000e+00> : vector<16x128xf32>
      %89 = tpu.matmul %87, %88, %cst_52 {dimension_numbers = #tpu.dot_dimension_numbers<[1], [0], [0], [1], [0, 0, 1, 1], [], []>} : vector<16x32xbf16>, vector<32x128xbf16>, vector<16x128xf32> -> vector<16x128xf32>
      %c0_53 = arith.constant 0 : index
      %c0_54 = arith.constant 0 : index
      %90 = vector.load %arg16[%c0_53, %c0_54] : memref<1x128xf32, #tpu.memory_space<vmem>>, vector<1x128xf32>
      %91 = vector.broadcast %90 : vector<1x128xf32> to vector<16x128xf32>
      %92 = arith.addf %89, %91 : vector<16x128xf32>
      %c0_55 = arith.constant 0 : index
      %c0_56 = arith.constant 0 : index
      %93 = vector.load %arg17[%c0_55, %c0_56] : memref<16x128xf32, #tpu.memory_space<vmem>>, vector<16x128xf32>
      tpu.vector_store %arg17[%c0_55, %c0_56], %92 {strides = array<i32>} : memref<16x128xf32, #tpu.memory_space<vmem>>, vector<16x128xf32>,
    } else {
    }
    return
  }
  func.func @transform_0(%arg0: i32, %arg1: i32) -> (i32, i32) {
    %c0_i32 = arith.constant 0 : i32
    return %arg0, %arg1 : i32, i32
  }
  func.func @transform_1(%arg0: i32, %arg1: i32) -> (i32, i32) {
    %c0_i32 = arith.constant 0 : i32
    %c0_i32_0 = arith.constant 0 : i32
    return %arg1, %c0_i32 : i32, i32
  }
  func.func @transform_2(%arg0: i32, %arg1: i32) -> (i32, i32) {
    %c0_i32 = arith.constant 0 : i32
    %c0_i32_0 = arith.constant 0 : i32
    return %arg0, %c0_i32 : i32, i32
  }
  func.func @transform_3(%arg0: i32, %arg1: i32) -> (i32, i32) {
    %c0_i32 = arith.constant 0 : i32
    %c0_i32_0 = arith.constant 0 : i32
    %c0_i32_1 = arith.constant 0 : i32
    return %c0_i32, %c0_i32_0 : i32, i32
  }
  func.func @transform_4(%arg0: i32, %arg1: i32) -> (i32, i32) {
    %c0_i32 = arith.constant 0 : i32
    %c0_i32_0 = arith.constant 0 : i32
    %c0_i32_1 = arith.constant 0 : i32
    return %c0_i32, %c0_i32_0 : i32, i32
  }
  func.func @transform_5(%arg0: i32, %arg1: i32) -> (i32, i32) {
    %c0_i32 = arith.constant 0 : i32
    %c0_i32_0 = arith.constant 0 : i32
    %c0_i32_1 = arith.constant 0 : i32
    return %c0_i32, %c0_i32_0 : i32, i32
  }
  func.func @transform_6(%arg0: i32, %arg1: i32) -> (i32, i32) {
    %c0_i32 = arith.constant 0 : i32
    %c0_i32_0 = arith.constant 0 : i32
    %c0_i32_1 = arith.constant 0 : i32
    return %c0_i32, %c0_i32_0 : i32, i32
  }
  func.func @transform_7(%arg0: i32, %arg1: i32) -> (i32, i32) {
    %c0_i32 = arith.constant 0 : i32
    %c0_i32_0 = arith.constant 0 : i32
    %c0_i32_1 = arith.constant 0 : i32
    return %c0_i32, %c0_i32_0 : i32, i32
  }
  func.func @transform_8(%arg0: i32, %arg1: i32) -> (i32, i32) {
    %c0_i32 = arith.constant 0 : i32
    %c0_i32_0 = arith.constant 0 : i32
    %c0_i32_1 = arith.constant 0 : i32
    return %c0_i32, %c0_i32_0 : i32, i32
  }
  func.func @transform_9(%arg0: i32, %arg1: i32) -> (i32, i32) {
    %c0_i32 = arith.constant 0 : i32
    %c0_i32_0 = arith.constant 0 : i32
    %c0_i32_1 = arith.constant 0 : i32
    return %c0_i32, %c0_i32_0 : i32, i32
  }
  func.func @transform_10(%arg0: i32, %arg1: i32) -> (i32, i32) {
    %c0_i32 = arith.constant 0 : i32
    %c0_i32_0 = arith.constant 0 : i32
    %c0_i32_1 = arith.constant 0 : i32
    return %c0_i32, %c0_i32_0 : i32, i32
  }
  func.func @transform_11(%arg0: i32, %arg1: i32) -> (i32, i32) {
    %c0_i32 = arith.constant 0 : i32
    %c0_i32_0 = arith.constant 0 : i32
    %c0_i32_1 = arith.constant 0 : i32
    return %c0_i32, %c0_i32_0 : i32, i32
  }
  func.func @transform_12(%arg0: i32, %arg1: i32) -> (i32, i32) {
    %c0_i32 = arith.constant 0 : i32
    %c0_i32_0 = arith.constant 0 : i32
    %c0_i32_1 = arith.constant 0 : i32
    return %c0_i32, %c0_i32_0 : i32, i32
  }
  func.func @transform_13(%arg0: i32, %arg1: i32) -> (i32, i32) {
    %c0_i32 = arith.constant 0 : i32
    %c0_i32_0 = arith.constant 0 : i32
    %c0_i32_1 = arith.constant 0 : i32
    return %c0_i32, %c0_i32_0 : i32, i32
  }
  func.func @transform_14(%arg0: i32, %arg1: i32) -> (i32, i32) {
    %c0_i32 = arith.constant 0 : i32
    %c0_i32_0 = arith.constant 0 : i32
    %c0_i32_1 = arith.constant 0 : i32
    return %c0_i32, %c0_i32_0 : i32, i32
  }
  func.func @transform_15(%arg0: i32, %arg1: i32) -> (i32, i32) {
    %c0_i32 = arith.constant 0 : i32
    %c0_i32_0 = arith.constant 0 : i32
    return %arg0, %c0_i32 : i32, i32
  }
}

module attributes {stable_mosaic.version = 11 : i64} {
  func.func @_msg_kernel(%arg0: i32, %arg1: memref<1x1xf32, #tpu.memory_space<smem>>, %arg2: memref<16x32xf32, #tpu.memory_space<vmem>>, %arg3: memref<1x32xf32, #tpu.memory_space<vmem>>, %arg4: memref<16x64xbf16, #tpu.memory_space<vmem>>) attributes {dimension_semantics = [#tpu.dimension_semantics<parallel>], iteration_bounds = array<i64: 1>, scalar_prefetch = 0 : i64, scratch_operands = 0 : i64, tpu.core_type = #tpu.core_type<tc>, window_params = [{transform_indices = @transform_0, window_bounds = array<i64: 1, 1>}, {transform_indices = @transform_1, window_bounds = array<i64: 16, 32>}, {pipeline_mode = #tpu.pipeline_mode<synchronous>, transform_indices = @transform_2, window_bounds = array<i64: 1, 32>}, {transform_indices = @transform_3, window_bounds = array<i64: 16, 64>}]} {
    %c0 = arith.constant 0 : index
    %c0_0 = arith.constant 0 : index
    %0 = memref.load %arg1[%c0, %c0_0] : memref<1x1xf32, #tpu.memory_space<smem>>
    %c0_1 = arith.constant 0 : index
    %c0_2 = arith.constant 0 : index
    %1 = vector.load %arg2[%c0_1, %c0_2] : memref<16x32xf32, #tpu.memory_space<vmem>>, vector<16x32xf32>
    %cst = arith.constant 0.000000e+00 : f32
    %2 = vector.broadcast %cst : f32 to vector<16x32xf32>
    %3 = arith.maximumf %1, %2 : vector<16x32xf32>
    %cst_3 = arith.constant 1.000000e-07 : f32
    %4 = vector.broadcast %cst_3 : f32 to vector<16x32xf32>
    %5 = arith.addf %3, %4 : vector<16x32xf32>
    %c0_4 = arith.constant 0 : index
    %c0_5 = arith.constant 0 : index
    %6 = vector.load %arg3[%c0_4, %c0_5] : memref<1x32xf32, #tpu.memory_space<vmem>>, vector<1x32xf32>
    %7 = vector.broadcast %6 : vector<1x32xf32> to vector<16x32xf32>
    %8 = arith.subf %5, %7 : vector<16x32xf32>
    %9 = vector.broadcast %0 : f32 to vector<16x32xf32>
    %10 = arith.mulf %9, %8 : vector<16x32xf32>
    %11 = math.exp %10 : vector<16x32xf32>
    %12 = arith.mulf %11, %5 : vector<16x32xf32>
    %13 = arith.truncf %12 : vector<16x32xf32> to vector<16x32xbf16>
    %c0_6 = arith.constant 0 : index
    %c0_7 = arith.constant 0 : index
    %14 = vector.load %arg4[%c0_6, %c0_7] : memref<16x64xbf16, #tpu.memory_space<vmem>>, vector<16x32xbf16>
    tpu.vector_store %arg4[%c0_6, %c0_7], %13 {strides = array<i32>} : memref<16x64xbf16, #tpu.memory_space<vmem>>, vector<16x32xbf16>,
    %15 = arith.truncf %11 : vector<16x32xf32> to vector<16x32xbf16>
    %c0_8 = arith.constant 0 : index
    %c32 = arith.constant 32 : index
    %16 = vector.load %arg4[%c0_8, %c32] : memref<16x64xbf16, #tpu.memory_space<vmem>>, vector<16x32xbf16>
    tpu.vector_store %arg4[%c0_8, %c32], %15 {strides = array<i32>} : memref<16x64xbf16, #tpu.memory_space<vmem>>, vector<16x32xbf16>,
    return
  }
  func.func @transform_0(%arg0: i32) -> (i32, i32) {
    %c0_i32 = arith.constant 0 : i32
    %c0_i32_0 = arith.constant 0 : i32
    %c0_i32_1 = arith.constant 0 : i32
    return %c0_i32, %c0_i32_0 : i32, i32
  }
  func.func @transform_1(%arg0: i32) -> (i32, i32) {
    %c0_i32 = arith.constant 0 : i32
    %c0_i32_0 = arith.constant 0 : i32
    return %arg0, %c0_i32 : i32, i32
  }
  func.func @transform_2(%arg0: i32) -> (i32, i32) {
    %c0_i32 = arith.constant 0 : i32
    %c0_i32_0 = arith.constant 0 : i32
    %c0_i32_1 = arith.constant 0 : i32
    return %c0_i32, %c0_i32_0 : i32, i32
  }
  func.func @transform_3(%arg0: i32) -> (i32, i32) {
    %c0_i32 = arith.constant 0 : i32
    %c0_i32_0 = arith.constant 0 : i32
    return %arg0, %c0_i32 : i32, i32
  }
}

</mosaic_0001>

<bundles_post_ra>
// kernel: model_forward.6
= control target key start
LH: loop header
LB: loop body
LE: loop exit
PB: predicated region body
PF: predicated region fallthrough
CT: control target
= control target key end

     0   :  { %vm27_vm0 = vcmask 64512   ;;  %vm83_vm1 = vcmask 1043456   ;;  %v185_v14 = vmov 0.0   ;;  %vm186_vm2 = vmmov 0   ;;  %s254_s0 = inlined_call_operand.vmem [shape: f32[16,8], index: 0, kind: input, shape index: {}]   ;;  %s255_s3 = inlined_call_operand.vmem [shape: bf16[8,64], index: 3, kind: input, shape index: {}]   ;;  %s256_s1 = inlined_call_operand.vmem [shape: f32[1,8], index: 1, kind: input, shape index: {}]   ;;  %s257_s2 = inlined_call_operand.vmem [shape: f32[1,8], index: 2, kind: input, shape index: {}]   ;;  %s258_s4 = inlined_call_operand.vmem [shape: f32[1,64], index: 4, kind: input, shape index: {}]   ;;  %s259_s5 = inlined_call_operand.vmem [shape: f32[16,64], index: 5, kind: output, shape index: {0}]   ;;  %s260_s6 = inlined_call_operand.vmem [shape: f32[1,32], index: 6, kind: output, shape index: {1}]  }
   0x1   :  { %v23_v0 = vld [vmem:[%s254_s0] sm:$0xff]  ;;  %v24_v1 = vld [vmem:[%s254_s0 + $0x8] sm:$0xff]  ;;  %173 = vmatprep.subr.bf16.mxu0 %v185_v14  ;;  %175 = vmatprep.mubr.msk.bf16.mxu0 %vm186_vm2, %v185_v14  ;;  %vm128_vm3 = vcmask 523264   ;;  %vm135_vm4 = vcmask 261120   ;;  %vm149_vm5 = vcmask 253952  }
   0x2   :  { %v28_v2 = vsel %vm27_vm0, %v23_v0, 0.0  ;;  %v31_v3 = vsel %vm27_vm0, %v24_v1, 0.0  ;;  %v72_v15 = vld [vmem:[%s255_s3] sm:$0xf] }
   0x3   :  { %29 = vadd.xlane.f32.xlu0 %v28_v2  ;;  %v85_v16 = vsel %vm83_vm1, %v72_v15, 0  ;;  %v167_v25 = vld [vmem:[%s256_s1] ss:$0 sm:$0xff] }
   0x4   :  { %174 = vmatpush3.bf16.msra.mxu0 %v85_v16  ;;  %v168_v29 = vld [vmem:[%s257_s2] ss:$0 sm:$0xff] }
   0x5   :  { %v169_v34 = vld [vmem:[%s258_s4] ss:$0 sm:$0xff] }
   0x7   :  { %32 = vadd.xlane.f32.xlu0 %v31_v3 }
  0x90   :  { %v30_v4 = vpop.xlane.xlu0 %29 }
  0x91   :  { %v35_v5 = vmul.f32 0.125, %v30_v4 }
  0x93   :  { %v37_v6 = vsub.f32 %v23_v0, %v35_v5 }
  0x94   :  { %v33_v7 = vpop.xlane.xlu0 %32 }
  0x95   :  { %v36_v8 = vmul.f32 0.125, %v33_v7  ;;  %v39_v9 = vmul.f32 %v37_v6, %v37_v6 }
  0x97   :  { %v38_v10 = vsub.f32 %v24_v1, %v36_v8  ;;  %v41_v11 = vsel %vm27_vm0, %v39_v9, 0.0 }
  0x98   :  { %42 = vadd.xlane.f32.xlu1 %v41_v11 }
  0x99   :  { %v40_v12 = vmul.f32 %v38_v10, %v38_v10 }
  0x9b   :  { %v44_v13 = vsel %vm27_vm0, %v40_v12, 0.0 }
  0x9c   :  { %45 = vadd.xlane.f32.xlu1 %v44_v13 }
 0x125   :  { %v43_v17 = vpop.xlane.xlu1 %42 }
 0x126   :  { %v47_v18 = vmul.f32 0.125, %v43_v17 }
 0x128   :  { %v49_v19 = vadd.f32 1e-05, %v47_v18 }
 0x129   :  { %v46_v20 = vpop.xlane.xlu1 %45 }
 0x12a   :  { %181 = vrsqrt.f32 %v49_v19  ;;  %v48_v21 = vmul.f32 0.125, %v46_v20 }
 0x12c   :  { %v50_v22 = vadd.f32 1e-05, %v48_v21 }
 0x12e   :  { %183 = vrsqrt.f32 %v50_v22 }
 0x134   :  { %v182_v23 = vpop.eup %181 }
 0x135   :  { %v53_v24 = vmul.f32 %v182_v23, %v37_v6 }
 0x137   :  { %v61_v28 = vmul.f32 %v167_v25, %v53_v24 }
 0x138   :  { %v184_v26 = vpop.eup %183 }
 0x139   :  { %v54_v27 = vmul.f32 %v184_v26, %v38_v10  ;;  %v69_v31 = vadd.f32 %v168_v29, %v61_v28 }
 0x13b   :  { %v62_v30 = vmul.f32 %v167_v25, %v54_v27 }
 0x13d   :  { %v70_v32 = vadd.f32 %v168_v29, %v62_v30 }
 0x13f   :  { %v71_v33 = vpack.c.bf16 %v70_v32, %v69_v31 }
 0x141   :  { %176 = vmatmul.mubr.msk.bf16.vlgmr.msra.gmra.mrb[0].mxu0 %vm27_vm0, %v71_v33 }
 0x214   :  { %v121_v35 = vpop.f32.mrb[0].mxu0 }
 0x215   :  { %v122_v36 = vadd.f32 %v169_v34, %v121_v35  ;;  %v177_v37 = vpop.f32.mrb[1].mxu0 }
 0x216   :  { %v124_v38 = vpop.f32.mrb[2].mxu0 }
 0x217   :  { %129 = vst.msk [vmem:[%s259_s5] sm:$0xff] %vm128_vm3, %v122_v36  ;;  %v131_v39 = vmax.f32 %v122_v36, 0.0  ;;  %v125_v40 = vadd.f32 %v169_v34, %v124_v38  ;;  %v178_v41 = vpop.f32.mrb[3].mxu0 }
 0x219   :  { %v133_v42 = vadd.f32 1e-07, %v131_v39  ;;  %130 = vst.msk [vmem:[%s259_s5 + $0x8] sm:$0xff] %vm128_vm3, %v125_v40  ;;  %v132_v43 = vmax.f32 %v125_v40, 0.0 }
 0x21b   :  { %v134_v44 = vadd.f32 1e-07, %v132_v43  ;;  %v136_v45 = vsel %vm135_vm4, %v133_v42, -inf }
 0x21d   :  { %v137_v46 = vsel %vm135_vm4, %v134_v44, -inf }
 0x21e   :  { %v138_v47 = vmax.f32 %v136_v45, %v137_v46 }
 0x220   :  { %v139_v48 = vrot.slane %v138_v47, 4 }
 0x222   :  { %v140_v49 = vmax.f32 %v138_v47, %v139_v48 }
 0x224   :  { %v141_v50 = vrot.slane %v140_v49, 2 }
 0x226   :  { %v142_v51 = vmax.f32 %v140_v49, %v141_v50 }
 0x228   :  { %v143_v52 = vrot.slane %v142_v51, 1 }
 0x22a   :  { %v144_v53 = vmax.f32 %v142_v51, %v143_v52 }
 0x22c   :  { %150 = vst.msk [vmem:[%s260_s6] sm:$0x1] %vm149_vm5, %v144_v53 }

// kernel: model_forward.7
= control target key start
LH: loop header
LB: loop body
LE: loop exit
PB: predicated region body
PF: predicated region fallthrough
CT: control target
= control target key end

     0   :  { %vm48_vm0 = vcmask 257024   ;;  %vm63_vm1 = vcmask 519424   ;;  %s129_s1 = inlined_call_operand.vmem [shape: f32[16,64], index: 1, kind: input, shape index: {}]   ;;  %s130_s2 = inlined_call_operand.vmem [shape: f32[1,32], index: 2, kind: input, shape index: {}]   ;;  %s131_s0 = inlined_call_operand.<no memory space> [shape: f32[1,1], index: 0, kind: input, shape index: {}]   ;;  %s132_s3 = inlined_call_operand.vmem [shape: bf16[16,64], index: 3, kind: output, shape index: {}]  }
   0x1   :  { %v16_v0 = vld [vmem:[%s129_s1] sm:$0xff]  ;;  %v17_v1 = vld [vmem:[%s129_s1 + $0x8] sm:$0xff]  ;;  %v31_v7 = vstv %s131_s0  ;;  %s84_s1 = smov 32  }
   0x2   :  { %v18_v2 = vmax.f32 %v16_v0, 0.0  ;;  %v19_v3 = vmax.f32 %v17_v1, 0.0  ;;  %v70_v4 = vld [vmem:[%s130_s2] ss:$0 sm:$0xff] }
   0x4   :  { %v20_v5 = vadd.f32 1e-07, %v18_v2  ;;  %v21_v6 = vadd.f32 1e-07, %v19_v3 }
   0x6   :  { %v29_v8 = vsub.f32 %v20_v5, %v70_v4  ;;  %v30_v9 = vsub.f32 %v21_v6, %v70_v4 }
   0x8   :  { %v32_v10 = vmul.f32 %v31_v7, %v29_v8  ;;  %v33_v11 = vmul.f32 %v31_v7, %v30_v9 }
   0xa   :  { %v34_v12 = vmul.f32 1.442695, %v32_v10  ;;  %v36_v13 = vmul.f32 1.442695, %v33_v11 }
   0xc   :  { %80 = vpow2.f32 %v34_v12 }
   0xd   :  { %82 = vpow2.f32 %v36_v13 }
  0x16   :  { %v81_v14 = vpop.eup %80 }
  0x17   :  { %v83_v15 = vpop.eup %82  ;;  %v77_v16 = vpack.c.bf16 %v81_v14, %v81_v14  ;;  %v38_v17 = vmul.f32 %v81_v14, %v20_v5 }
  0x18   :  { %v39_v18 = vmul.f32 %v83_v15, %v21_v6  ;;  %v78_v19 = vpack.c.bf16 %v83_v15, %v83_v15 }
  0x19   :  { %57 = vrot.lane.b32.xlu0 %v77_v16, %s84_s1  ;;  %v75_v20 = vpack.c.bf16 %v38_v17, %v38_v17 }
  0x1a   :  { %v76_v21 = vpack.c.bf16 %v39_v18, %v39_v18 }
  0x1b   :  { %49 = vst.msk [vmem:[%s132_s3] sm:$0xf] %vm48_vm0, %v75_v20 }
  0x1c   :  { %50 = vst.msk [vmem:[%s132_s3 + $0x4] sm:$0xf] %vm48_vm0, %v76_v21 }
  0x1d   :  { %59 = vrot.lane.b32.xlu0 %v78_v19, %s84_s1 }
  0x8b   :  { %v58_v22 = vpop.permute.xlu0 %57 }
  0x8c   :  { %64 = vst.msk [vmem:[%s132_s3] sm:$0xf] %vm63_vm1, %v58_v22 }
  0x8f   :  { %v60_v23 = vpop.permute.xlu0 %59 }
  0x90   :  { %65 = vst.msk [vmem:[%s132_s3 + $0x4] sm:$0xf] %vm63_vm1, %v60_v23 }

// kernel: model_forward.8
= control target key start
LH: loop header
LB: loop body
LE: loop exit
PB: predicated region body
PF: predicated region fallthrough
CT: control target
= control target key end

     0   :  { %vm43_vm0 = vcmask 523264   ;;  %v473_v0 = vmov 0.0   ;;  %vm474_vm1 = vmmov 0   ;;  %vm63_vm2 = vcmask 130048   ;;  %s475_s22 = smov 96   ;;  %s618_s1 = inlined_call_operand.vmem [shape: bf16[16,64], index: 1, kind: input, shape index: {}]   ;;  %s619_s0 = inlined_call_operand.vmem [shape: bf16[16,16], index: 0, kind: input, shape index: {}]   ;;  %s620_s2 = inlined_call_operand.vmem [shape: f32[16,64], index: 2, kind: input, shape index: {}]   ;;  %s621_s3 = inlined_call_operand.vmem [shape: bf16[32,64], index: 3, kind: input, shape index: {}]   ;;  %s622_s4 = inlined_call_operand.vmem [shape: f32[1,64], index: 4, kind: input, shape index: {}]   ;;  %s623_s7 = inlined_call_operand.vmem [shape: bf16[64,32], index: 7, kind: input, shape index: {}]   ;;  %s624_s5 = inlined_call_operand.vmem [shape: f32[1,64], index: 5, kind: input, shape index: {}]   ;;  %s625_s6 = inlined_call_operand.vmem [shape: f32[1,64], index: 6, kind: input, shape index: {}]   ;;  %s626_s8 = inlined_call_operand.vmem [shape: f32[1,32], index: 8, kind: input, shape index: {}]   ;;  %s627_s9 = inlined_call_operand.vmem [shape: f32[1,32], index: 9, kind: input, shape index: {}]   ;;  %s628_s10 = inlined_call_operand.vmem [shape: f32[1,32], index: 10, kind: input, shape index: {}]   ;;  %s629_s11 = inlined_call_operand.vmem [shape: f32[16,32], index: 11, kind: output, shape index: {}]  }
   0x1   :  { %424 = vmatprep.subr.bf16.mxu1 %v473_v0  ;;  %v453_v1 = vld [vmem:[%s618_s1] sm:$0xff]   ;;  %426 = vmatprep.mubr.msk.bf16.mxu1 %vm474_vm1, %v473_v0  ;;  %44 = vst.msk [vmem:[#allocation2] sm:$0xff] %vm43_vm0, %v473_v0  ;;  %45 = vst.msk [vmem:[#allocation2 + $0x8] sm:$0xff] %vm43_vm0, %v473_v0  ;;  %v119_v4 = vld [vmem:[%s620_s2 + $0x8] sm:$0xff]  ;;  %vm168_vm3 = vcmask 261120  }
   0x2   :  { %v454_v2 = vld [vmem:[%s619_s0] sm:$0xff]   ;;  %438 = vmatprep.subr.bf16.mxu0 %v473_v0  ;;  %446 = vmatprep.mubr.msk.bf16.mxu0 %vm474_vm1, %v473_v0  ;;  %v456_v18 = vld [vmem:[%s621_s3 + $0x8] sm:$0xff]   ;;  %v459_v51 = vld [vmem:[%s623_s7 + $0x10] sm:$0xff]  }
   0x3   :  { %425 = vmatpush3.bf16.msra.mxu1 %v453_v1  ;;  %v118_v3 = vld [vmem:[%s620_s2] sm:$0xff]  ;;  %v458_v50 = vld [vmem:[%s623_s7 + $0x8] sm:$0xff]   ;;  %v460_v52 = vld [vmem:[%s623_s7 + $0x18] sm:$0xff]  }
   0x4   :  { %430 = vmatprep.subr.bf16.mxu1 %v473_v0  ;;  %136 = vrot.lane.b32.xlu1 %v118_v3, %s475_s22  ;;  %v455_v17 = vld [vmem:[%s621_s3] sm:$0xff]  }
   0x5   :  { %v400_v30 = vld [vmem:[%s622_s4] ss:$0 sm:$0xff] }
   0x6   :  { %427 = vmatmul.mubr.msk.bf16.vlgmr.msra.gmra.mrb[0].mxu1 %vm63_vm2, %v454_v2  ;;  %v457_v49 = vld [vmem:[%s623_s7] sm:$0xff]  }
   0x7   :  { %434 = vmatprep.mubr.msk.bf16.mxu1 %vm474_vm1, %v473_v0  ;;  %431 = vmatpush3.bf16.msra.mxu1 %v455_v17  ;;  %v404_v60 = vld [vmem:[%s624_s5] ss:$0 sm:$0xff] }
   0x8   :  { %138 = vrot.lane.b32.xlu1 %v119_v4, %s475_s22  ;;  %v46_v5 = vld [vmem:[#allocation2] sm:$0xff]  ;;  %v47_v7 = vld [vmem:[#allocation2 + $0x8] sm:$0xff]  ;;  %432 = vmatprep.subr.bf16.mxu1 %v473_v0 }
   0x9   :  { %439 = vmatpush3.bf16.msra.mxu0 %v457_v49 }
   0xa   :  { %440 = vmatprep.subr.bf16.mxu0 %v473_v0 }
   0xb   :  { %433 = vmatpush3.bf16.msra.mxu1 %v456_v18 }
   0xd   :  { %441 = vmatpush3.bf16.msra.mxu0 %v458_v50 }
   0xe   :  { %442 = vmatprep.subr.bf16.mxu0 %v473_v0 }
  0x11   :  { %443 = vmatpush3.bf16.msra.mxu0 %v459_v51 }
  0x12   :  { %444 = vmatprep.subr.bf16.mxu0 %v473_v0  ;;  %v405_v0 = vld [vmem:[%s625_s6] ss:$0 sm:$0xff] }
  0x15   :  { %445 = vmatpush3.bf16.msra.mxu0 %v460_v52 }
  0x76   :  { %v137_v21 = vpop.permute.xlu1 %136 }
  0x7a   :  { %v139_v25 = vpop.permute.xlu1 %138 }
  0xd9   :  { %v101_v6 = vpop.f32.mrb[0].mxu1 }
  0xda   :  { %v108_v8 = vadd.f32 %v101_v6, %v46_v5  ;;  %v428_v9 = vpop.f32.mrb[1].mxu1 }
  0xdb   :  { %v104_v10 = vpop.f32.mrb[2].mxu1 }
  0xdc   :  { %111 = vst.msk [vmem:[#allocation2] sm:$0xff] %vm43_vm0, %v108_v8  ;;  %v109_v11 = vadd.f32 %v104_v10, %v47_v7  ;;  %v429_v12 = vpop.f32.mrb[3].mxu1  ;;  %v406_v8 = vld [vmem:[%s626_s8] ss:$0 sm:$0xff] }
  0xde   :  { %112 = vst.msk [vmem:[#allocation2 + $0x8] sm:$0xff] %vm43_vm0, %v109_v11 }
  0xe3   :  { %v116_v13 = vld [vmem:[#allocation2] sm:$0xff] }
  0xe4   :  { %v120_v14 = vmax.f32 %v116_v13, 1e-12 }
  0xe5   :  { %v117_v15 = vld [vmem:[#allocation2 + $0x8] sm:$0xff] }
  0xe6   :  { %461 = vrcp.f32 %v120_v14  ;;  %v121_v16 = vmax.f32 %v117_v15, 1e-12 }
  0xe8   :  { %463 = vrcp.f32 %v121_v16 }
  0xf0   :  { %v462_v19 = vpop.eup %461 }
  0xf1   :  { %126 = vrot.lane.b32.xlu0 %v462_v19, %s475_s22 }
  0xf2   :  { %v464_v20 = vpop.eup %463 }
  0xf5   :  { %128 = vrot.lane.b32.xlu0 %v464_v20, %s475_s22 }
 0x163   :  { %v127_v22 = vpop.permute.xlu0 %126 }
 0x164   :  { %v132_v23 = vmul.f32 %v127_v22, %v116_v13 }
 0x166   :  { %v142_v27 = vadd.f32 %v137_v21, %v132_v23 }
 0x167   :  { %v129_v24 = vpop.permute.xlu0 %128 }
 0x168   :  { %v133_v26 = vmul.f32 %v129_v24, %v117_v15 }
 0x16a   :  { %v143_v28 = vadd.f32 %v139_v25, %v133_v26 }
 0x16c   :  { %v144_v29 = vpack.c.bf16 %v143_v28, %v142_v27 }
 0x16e   :  { %435 = vmatmul.mubr.msk.bf16.vlgmr.msra.gmra.mrb[4].mxu1 %vm168_vm3, %v144_v29 }
 0x241   :  { %v206_v31 = vpop.f32.mrb[4].mxu1 }
 0x242   :  { %v207_v32 = vadd.f32 %v400_v30, %v206_v31  ;;  %v436_v33 = vpop.f32.mrb[5].mxu1 }
 0x243   :  { %v209_v34 = vpop.f32.mrb[6].mxu1 }
 0x244   :  { %v210_v35 = vadd.f32 %v400_v30, %v209_v34  ;;  %v437_v36 = vpop.f32.mrb[7].mxu1  ;;  %v215_v37 = vsel %vm43_vm0, %v207_v32, 0.0  ;;  %v412_v34 = vld [vmem:[%s627_s9] ss:$0 sm:$0xff] }
 0x245   :  { %216 = vadd.xlane.f32.xlu0 %v215_v37  ;;  %v413_v37 = vld [vmem:[%s628_s10] ss:$0 sm:$0xff] }
 0x246   :  { %v218_v38 = vsel %vm43_vm0, %v210_v35, 0.0 }
 0x247   :  { %219 = vadd.xlane.f32.xlu1 %v218_v38 }
 0x2d2   :  { %v217_v39 = vpop.xlane.xlu0 %216 }
 0x2d3   :  { %v222_v40 = vmul.f32 0.015625, %v217_v39 }
 0x2d4   :  { %v220_v41 = vpop.xlane.xlu1 %219 }
 0x2d5   :  { %v224_v42 = vsub.f32 %v207_v32, %v222_v40  ;;  %v223_v43 = vmul.f32 0.015625, %v220_v41 }
 0x2d7   :  { %v225_v44 = vsub.f32 %v210_v35, %v223_v43  ;;  %v226_v45 = vmul.f32 %v224_v42, %v224_v42 }
 0x2d9   :  { %v228_v46 = vsel %vm43_vm0, %v226_v45, 0.0  ;;  %v227_v47 = vmul.f32 %v225_v44, %v225_v44 }
 0x2da   :  { %229 = vadd.xlane.f32.xlu0 %v228_v46 }
 0x2db   :  { %v231_v48 = vsel %vm43_vm0, %v227_v47, 0.0 }
 0x2de   :  { %232 = vadd.xlane.f32.xlu0 %v231_v48 }
 0x367   :  { %v230_v53 = vpop.xlane.xlu0 %229 }
 0x368   :  { %v234_v54 = vmul.f32 0.015625, %v230_v53 }
 0x36a   :  { %v236_v55 = vadd.f32 1e-05, %v234_v54 }
 0x36b   :  { %v233_v56 = vpop.xlane.xlu0 %232 }
 0x36c   :  { %465 = vrsqrt.f32 %v236_v55  ;;  %v235_v57 = vmul.f32 0.015625, %v233_v56 }
 0x36e   :  { %v237_v58 = vadd.f32 1e-05, %v235_v57 }
 0x370   :  { %467 = vrsqrt.f32 %v237_v58 }
 0x376   :  { %v466_v59 = vpop.eup %465 }
 0x377   :  { %v240_v61 = vmul.f32 %v466_v59, %v224_v42 }
 0x379   :  { %v248_v62 = vmul.f32 %v404_v60, %v240_v61 }
 0x37a   :  { %v468_v63 = vpop.eup %467 }
 0x37b   :  { %v241_v1 = vmul.f32 %v468_v63, %v225_v44  ;;  %v256_v3 = vadd.f32 %v405_v0, %v248_v62 }
 0x37d   :  { %v249_v2 = vmul.f32 %v404_v60, %v241_v1  ;;  %v258_v5 = vmax.f32 %v256_v3, 0.0 }
 0x37f   :  { %v257_v4 = vadd.f32 %v405_v0, %v249_v2 }
 0x381   :  { %v259_v6 = vmax.f32 %v257_v4, 0.0 }
 0x383   :  { %v260_v7 = vpack.c.bf16 %v259_v6, %v258_v5 }
 0x385   :  { %447 = vmatmul.mubr.msk.bf16.vlgmr.msra.gmra.mrb[0].mxu0 %vm43_vm0, %v260_v7 }
 0x458   :  { %v337_v9 = vpop.f32.mrb[0].mxu0 }
 0x459   :  { %v338_v10 = vadd.f32 %v406_v8, %v337_v9  ;;  %v448_v11 = vpop.f32.mrb[1].mxu0 }
 0x45a   :  { %v340_v12 = vpop.f32.mrb[2].mxu0 }
 0x45b   :  { %v341_v13 = vadd.f32 %v406_v8, %v340_v12  ;;  %v449_v14 = vpop.f32.mrb[3].mxu0  ;;  %v346_v15 = vsel %vm168_vm3, %v338_v10, 0.0 }
 0x45c   :  { %347 = vadd.xlane.f32.xlu1 %v346_v15 }
 0x45d   :  { %v349_v16 = vsel %vm168_vm3, %v341_v13, 0.0 }
 0x45e   :  { %350 = vadd.xlane.f32.xlu0 %v349_v16 }
 0x4e9   :  { %v348_v17 = vpop.xlane.xlu1 %347 }
 0x4ea   :  { %v353_v18 = vmul.f32 0.03125, %v348_v17 }
 0x4eb   :  { %v351_v19 = vpop.xlane.xlu0 %350 }
 0x4ec   :  { %v355_v20 = vsub.f32 %v338_v10, %v353_v18  ;;  %v354_v21 = vmul.f32 0.03125, %v351_v19 }
 0x4ee   :  { %v356_v22 = vsub.f32 %v341_v13, %v354_v21  ;;  %v357_v23 = vmul.f32 %v355_v20, %v355_v20 }
 0x4f0   :  { %v359_v24 = vsel %vm168_vm3, %v357_v23, 0.0  ;;  %v358_v25 = vmul.f32 %v356_v22, %v356_v22 }
 0x4f1   :  { %360 = vadd.xlane.f32.xlu1 %v359_v24 }
 0x4f2   :  { %v362_v26 = vsel %vm168_vm3, %v358_v25, 0.0 }
 0x4f3   :  { %363 = vadd.xlane.f32.xlu0 %v362_v26 }
 0x57e   :  { %v361_v27 = vpop.xlane.xlu1 %360 }
 0x57f   :  { %v365_v28 = vmul.f32 0.03125, %v361_v27 }
 0x580   :  { %v364_v29 = vpop.xlane.xlu0 %363 }
 0x581   :  { %v367_v30 = vadd.f32 1e-05, %v365_v28  ;;  %v366_v31 = vmul.f32 0.03125, %v364_v29 }
 0x583   :  { %469 = vrsqrt.f32 %v367_v30  ;;  %v368_v32 = vadd.f32 1e-05, %v366_v31 }
 0x585   :  { %471 = vrsqrt.f32 %v368_v32 }
 0x58d   :  { %v470_v33 = vpop.eup %469 }
 0x58e   :  { %v371_v35 = vmul.f32 %v470_v33, %v355_v20 }
 0x58f   :  { %v472_v36 = vpop.eup %471 }
 0x590   :  { %v379_v38 = vmul.f32 %v412_v34, %v371_v35  ;;  %v372_v39 = vmul.f32 %v472_v36, %v356_v22 }
 0x592   :  { %v387_v40 = vadd.f32 %v413_v37, %v379_v38  ;;  %v380_v41 = vmul.f32 %v412_v34, %v372_v39 }
 0x594   :  { %v389_v42 = vmax.f32 %v387_v40, 0.0  ;;  %v388_v43 = vadd.f32 %v413_v37, %v380_v41 }
 0x596   :  { %391 = vst.msk [vmem:[%s629_s11] sm:$0xff] %vm168_vm3, %v389_v42  ;;  %v390_v44 = vmax.f32 %v388_v43, 0.0 }
 0x598   :  { %392 = vst.msk [vmem:[%s629_s11 + $0x8] sm:$0xff] %vm168_vm3, %v390_v44 }

// kernel: model_forward.9
= control target key start
LH: loop header
LB: loop body
LE: loop exit
PB: predicated region body
PF: predicated region fallthrough
CT: control target
= control target key end

     0   :  { %vm14_vm0 = vcmask 261120   ;;  %vm28_vm1 = vcmask 253952   ;;  %s61_s0 = inlined_call_operand.vmem [shape: f32[16,32], index: 0, kind: input, shape index: {}]   ;;  %s62_s1 = inlined_call_operand.vmem [shape: f32[1,32], index: 1, kind: output, shape index: {}]  }
   0x1   :  { %v8_v0 = vld [vmem:[%s61_s0] sm:$0xff]  ;;  %v9_v1 = vld [vmem:[%s61_s0 + $0x8] sm:$0xff] }
   0x2   :  { %v10_v2 = vmax.f32 %v8_v0, 0.0  ;;  %v11_v3 = vmax.f32 %v9_v1, 0.0 }
   0x4   :  { %v12_v4 = vadd.f32 1e-07, %v10_v2  ;;  %v13_v5 = vadd.f32 1e-07, %v11_v3 }
   0x6   :  { %v15_v6 = vsel %vm14_vm0, %v12_v4, -inf  ;;  %v16_v7 = vsel %vm14_vm0, %v13_v5, -inf }
   0x7   :  { %v17_v8 = vmax.f32 %v15_v6, %v16_v7 }
   0x9   :  { %v18_v9 = vrot.slane %v17_v8, 4 }
   0xb   :  { %v19_v10 = vmax.f32 %v17_v8, %v18_v9 }
   0xd   :  { %v20_v11 = vrot.slane %v19_v10, 2 }
   0xf   :  { %v21_v12 = vmax.f32 %v19_v10, %v20_v11 }
  0x11   :  { %v22_v13 = vrot.slane %v21_v12, 1 }
  0x13   :  { %v23_v14 = vmax.f32 %v21_v12, %v22_v13 }
  0x15   :  { %29 = vst.msk [vmem:[%s62_s1] sm:$0x1] %vm28_vm1, %v23_v14 }

// kernel: model_forward.10
= control target key start
LH: loop header
LB: loop body
LE: loop exit
PB: predicated region body
PF: predicated region fallthrough
CT: control target
= control target key end

     0   :  { %vm48_vm0 = vcmask 257024   ;;  %vm63_vm1 = vcmask 519424   ;;  %s129_s1 = inlined_call_operand.vmem [shape: f32[16,32], index: 1, kind: input, shape index: {}]   ;;  %s130_s2 = inlined_call_operand.vmem [shape: f32[1,32], index: 2, kind: input, shape index: {}]   ;;  %s131_s0 = inlined_call_operand.<no memory space> [shape: f32[1,1], index: 0, kind: input, shape index: {}]   ;;  %s132_s3 = inlined_call_operand.vmem [shape: bf16[16,64], index: 3, kind: output, shape index: {}]  }
   0x1   :  { %v16_v0 = vld [vmem:[%s129_s1] sm:$0xff]  ;;  %v17_v1 = vld [vmem:[%s129_s1 + $0x8] sm:$0xff]  ;;  %v31_v7 = vstv %s131_s0  ;;  %s84_s1 = smov 32  }
   0x2   :  { %v18_v2 = vmax.f32 %v16_v0, 0.0  ;;  %v19_v3 = vmax.f32 %v17_v1, 0.0  ;;  %v70_v4 = vld [vmem:[%s130_s2] ss:$0 sm:$0xff] }
   0x4   :  { %v20_v5 = vadd.f32 1e-07, %v18_v2  ;;  %v21_v6 = vadd.f32 1e-07, %v19_v3 }
   0x6   :  { %v29_v8 = vsub.f32 %v20_v5, %v70_v4  ;;  %v30_v9 = vsub.f32 %v21_v6, %v70_v4 }
   0x8   :  { %v32_v10 = vmul.f32 %v31_v7, %v29_v8  ;;  %v33_v11 = vmul.f32 %v31_v7, %v30_v9 }
   0xa   :  { %v34_v12 = vmul.f32 1.442695, %v32_v10  ;;  %v36_v13 = vmul.f32 1.442695, %v33_v11 }
   0xc   :  { %80 = vpow2.f32 %v34_v12 }
   0xd   :  { %82 = vpow2.f32 %v36_v13 }
  0x16   :  { %v81_v14 = vpop.eup %80 }
  0x17   :  { %v83_v15 = vpop.eup %82  ;;  %v77_v16 = vpack.c.bf16 %v81_v14, %v81_v14  ;;  %v38_v17 = vmul.f32 %v81_v14, %v20_v5 }
  0x18   :  { %v39_v18 = vmul.f32 %v83_v15, %v21_v6  ;;  %v78_v19 = vpack.c.bf16 %v83_v15, %v83_v15 }
  0x19   :  { %57 = vrot.lane.b32.xlu0 %v77_v16, %s84_s1  ;;  %v75_v20 = vpack.c.bf16 %v38_v17, %v38_v17 }
  0x1a   :  { %v76_v21 = vpack.c.bf16 %v39_v18, %v39_v18 }
  0x1b   :  { %49 = vst.msk [vmem:[%s132_s3] sm:$0xf] %vm48_vm0, %v75_v20 }
  0x1c   :  { %50 = vst.msk [vmem:[%s132_s3 + $0x4] sm:$0xf] %vm48_vm0, %v76_v21 }
  0x1d   :  { %59 = vrot.lane.b32.xlu0 %v78_v19, %s84_s1 }
  0x8b   :  { %v58_v22 = vpop.permute.xlu0 %57 }
  0x8c   :  { %64 = vst.msk [vmem:[%s132_s3] sm:$0xf] %vm63_vm1, %v58_v22 }
  0x8f   :  { %v60_v23 = vpop.permute.xlu0 %59 }
  0x90   :  { %65 = vst.msk [vmem:[%s132_s3 + $0x4] sm:$0xf] %vm63_vm1, %v60_v23 }

// kernel: model_forward.11
= control target key start
LH: loop header
LB: loop body
LE: loop exit
PB: predicated region body
PF: predicated region fallthrough
CT: control target
= control target key end

     0   :  { %vm55_vm0 = vcmask 523264   ;;  %v647_v0 = vmov 0.0   ;;  %vm648_vm1 = vmmov 0   ;;  %vm75_vm2 = vcmask 130048   ;;  %s649_s24 = smov 96   ;;  %s841_s1 = inlined_call_operand.vmem [shape: bf16[16,64], index: 1, kind: input, shape index: {}]   ;;  %s842_s0 = inlined_call_operand.vmem [shape: bf16[16,16], index: 0, kind: input, shape index: {}]   ;;  %s843_s3 = inlined_call_operand.vmem [shape: bf16[32,64], index: 3, kind: input, shape index: {}]   ;;  %s844_s2 = inlined_call_operand.vmem [shape: f32[16,32], index: 2, kind: input, shape index: {}]   ;;  %s845_s4 = inlined_call_operand.vmem [shape: f32[1,64], index: 4, kind: input, shape index: {}]   ;;  %s846_s7 = inlined_call_operand.vmem [shape: bf16[64,32], index: 7, kind: input, shape index: {}]   ;;  %s847_s5 = inlined_call_operand.vmem [shape: f32[1,64], index: 5, kind: input, shape index: {}]   ;;  %s848_s6 = inlined_call_operand.vmem [shape: f32[1,64], index: 6, kind: input, shape index: {}]   ;;  %s849_s8 = inlined_call_operand.vmem [shape: f32[1,32], index: 8, kind: input, shape index: {}]   ;;  %s850_s11 = inlined_call_operand.vmem [shape: bf16[32,32], index: 11, kind: input, shape index: {}]   ;;  %s851_s9 = inlined_call_operand.vmem [shape: f32[1,32], index: 9, kind: input, shape index: {}]   ;;  %s852_s10 = inlined_call_operand.vmem [shape: f32[1,32], index: 10, kind: input, shape index: {}]   ;;  %s853_s13 = inlined_call_operand.vmem [shape: bf16[32,128], index: 13, kind: input, shape index: {}]   ;;  %s854_s12 = inlined_call_operand.vmem [shape: f32[1,32], index: 12, kind: input, shape index: {}]   ;;  %s855_s14 = inlined_call_operand.vmem [shape: f32[1,128], index: 14, kind: input, shape index: {}]   ;;  %s856_s15 = inlined_call_operand.vmem [shape: f32[16,128], index: 15, kind: output, shape index: {}]  }
   0x1   :  { %578 = vmatprep.subr.bf16.mxu0 %v647_v0  ;;  %v623_v1 = vld [vmem:[%s841_s1] sm:$0xff]   ;;  %580 = vmatprep.mubr.msk.bf16.mxu0 %vm648_vm1, %v647_v0  ;;  %56 = vst.msk [vmem:[#allocation2] sm:$0xff] %vm55_vm0, %v647_v0  ;;  %57 = vst.msk [vmem:[#allocation2 + $0x8] sm:$0xff] %vm55_vm0, %v647_v0  ;;  %v626_v16 = vld [vmem:[%s843_s3 + $0x8] sm:$0xff]   ;;  %vm172_vm3 = vcmask 261120  }
   0x2   :  { %v624_v2 = vld [vmem:[%s842_s0] sm:$0xff]   ;;  %584 = vmatprep.subr.bf16.mxu1 %v647_v0  ;;  %588 = vmatprep.mubr.msk.bf16.mxu1 %vm648_vm1, %v647_v0  ;;  %v131_v22 = vld [vmem:[%s844_s2 + $0x8] sm:$0xff]  ;;  %v629_v49 = vld [vmem:[%s846_s7 + $0x10] sm:$0xff]  }
   0x3   :  { %579 = vmatpush3.bf16.msra.mxu0 %v623_v1  ;;  %v625_v15 = vld [vmem:[%s843_s3] sm:$0xff]   ;;  %v628_v48 = vld [vmem:[%s846_s7 + $0x8] sm:$0xff]   ;;  %v630_v50 = vld [vmem:[%s846_s7 + $0x18] sm:$0xff]  }
   0x4   :  { %592 = vmatprep.subr.bf16.mxu0 %v647_v0  ;;  %585 = vmatpush3.bf16.msra.mxu1 %v625_v15  ;;  %v130_v21 = vld [vmem:[%s844_s2] sm:$0xff] }
   0x5   :  { %586 = vmatprep.subr.bf16.mxu1 %v647_v0  ;;  %v540_v28 = vld [vmem:[%s845_s4] ss:$0 sm:$0xff] }
   0x6   :  { %581 = vmatmul.mubr.msk.bf16.vlgmr.msra.gmra.mrb[0].mxu0 %vm75_vm2, %v624_v2  ;;  %v627_v47 = vld [vmem:[%s846_s7] sm:$0xff]  }
   0x7   :  { %600 = vmatprep.mubr.msk.bf16.mxu0 %vm648_vm1, %v647_v0  ;;  %593 = vmatpush3.bf16.msra.mxu0 %v627_v47  ;;  %v544_v58 = vld [vmem:[%s847_s5] ss:$0 sm:$0xff] }
   0x8   :  { %v58_v3 = vld [vmem:[#allocation2] sm:$0xff]  ;;  %v59_v5 = vld [vmem:[#allocation2 + $0x8] sm:$0xff]  ;;  %587 = vmatpush3.bf16.msra.mxu1 %v626_v16  ;;  %594 = vmatprep.subr.bf16.mxu0 %v647_v0 }
   0x9   :  { %604 = vmatprep.subr.bf16.mxu1 %v647_v0  ;;  %v545_v62 = vld [vmem:[%s848_s6] ss:$0 sm:$0xff] }
   0xa   :  { %v554_v47 = vld [vmem:[%s854_s12] ss:$0 sm:$0xff] }
   0xb   :  { %595 = vmatpush3.bf16.msra.mxu0 %v628_v48 }
   0xc   :  { %596 = vmatprep.subr.bf16.mxu0 %v647_v0 }
   0xf   :  { %597 = vmatpush3.bf16.msra.mxu0 %v629_v49 }
  0x10   :  { %598 = vmatprep.subr.bf16.mxu0 %v647_v0 }
  0x13   :  { %599 = vmatpush3.bf16.msra.mxu0 %v630_v50 }
  0xd9   :  { %v113_v4 = vpop.f32.mrb[0].mxu0 }
  0xda   :  { %v120_v6 = vadd.f32 %v113_v4, %v58_v3  ;;  %v582_v7 = vpop.f32.mrb[1].mxu0 }
  0xdb   :  { %v116_v8 = vpop.f32.mrb[2].mxu0  ;;  %v546_v7 = vld [vmem:[%s849_s8] ss:$0 sm:$0xff] }
  0xdc   :  { %123 = vst.msk [vmem:[#allocation2] sm:$0xff] %vm55_vm0, %v120_v6  ;;  %v121_v9 = vadd.f32 %v116_v8, %v59_v5  ;;  %v583_v10 = vpop.f32.mrb[3].mxu0 }
  0xde   :  { %124 = vst.msk [vmem:[#allocation2 + $0x8] sm:$0xff] %vm55_vm0, %v121_v9 }
  0xe3   :  { %v128_v11 = vld [vmem:[#allocation2] sm:$0xff] }
  0xe4   :  { %v132_v12 = vmax.f32 %v128_v11, 1e-12 }
  0xe5   :  { %v129_v13 = vld [vmem:[#allocation2 + $0x8] sm:$0xff] }
  0xe6   :  { %635 = vrcp.f32 %v132_v12  ;;  %v133_v14 = vmax.f32 %v129_v13, 1e-12 }
  0xe8   :  { %637 = vrcp.f32 %v133_v14 }
  0xf0   :  { %v636_v17 = vpop.eup %635 }
  0xf1   :  { %138 = vrot.lane.b32.xlu0 %v636_v17, %s649_s24 }
  0xf2   :  { %v638_v18 = vpop.eup %637 }
  0xf5   :  { %140 = vrot.lane.b32.xlu0 %v638_v18, %s649_s24 }
 0x163   :  { %v139_v19 = vpop.permute.xlu0 %138 }
 0x164   :  { %v144_v20 = vmul.f32 %v139_v19, %v128_v11 }
 0x166   :  { %v146_v25 = vadd.f32 %v144_v20, %v130_v21 }
 0x167   :  { %v141_v23 = vpop.permute.xlu0 %140 }
 0x168   :  { %v145_v24 = vmul.f32 %v141_v23, %v129_v13 }
 0x16a   :  { %v147_v26 = vadd.f32 %v145_v24, %v131_v22 }
 0x16c   :  { %v148_v27 = vpack.c.bf16 %v147_v26, %v146_v25  ;;  %v631_v26 = vld [vmem:[%s850_s11] sm:$0xff]  }
 0x16e   :  { %589 = vmatmul.mubr.msk.bf16.vlgmr.msra.gmra.mrb[0].mxu1 %vm172_vm3, %v148_v27  ;;  %v632_v27 = vld [vmem:[%s850_s11 + $0x8] sm:$0xff]  }
 0x16f   :  { %608 = vmatprep.mubr.msk.bf16.mxu1 %vm648_vm1, %v647_v0  ;;  %605 = vmatpush3.bf16.msra.mxu1 %v631_v26 }
 0x170   :  { %606 = vmatprep.subr.bf16.mxu1 %v647_v0 }
 0x173   :  { %607 = vmatpush3.bf16.msra.mxu1 %v632_v27 }
 0x174   :  { %612 = vmatprep.subr.bf16.mxu1 %v647_v0 }
 0x241   :  { %v210_v29 = vpop.f32.mrb[0].mxu1 }
 0x242   :  { %v211_v30 = vadd.f32 %v540_v28, %v210_v29  ;;  %v590_v31 = vpop.f32.mrb[1].mxu1 }
 0x243   :  { %v213_v32 = vpop.f32.mrb[2].mxu1 }
 0x244   :  { %v214_v33 = vadd.f32 %v540_v28, %v213_v32  ;;  %v591_v34 = vpop.f32.mrb[3].mxu1  ;;  %v219_v35 = vsel %vm55_vm0, %v211_v30, 0.0 }
 0x245   :  { %220 = vadd.xlane.f32.xlu1 %v219_v35 }
 0x246   :  { %v222_v36 = vsel %vm55_vm0, %v214_v33, 0.0 }
 0x249   :  { %223 = vadd.xlane.f32.xlu1 %v222_v36  ;;  %v552_v36 = vld [vmem:[%s851_s9] ss:$0 sm:$0xff] }
 0x2d2   :  { %v221_v37 = vpop.xlane.xlu1 %220 }
 0x2d3   :  { %v226_v38 = vmul.f32 0.015625, %v221_v37 }
 0x2d5   :  { %v228_v39 = vsub.f32 %v211_v30, %v226_v38 }
 0x2d6   :  { %v224_v40 = vpop.xlane.xlu1 %223 }
 0x2d7   :  { %v227_v41 = vmul.f32 0.015625, %v224_v40  ;;  %v230_v42 = vmul.f32 %v228_v39, %v228_v39  ;;  %v553_v40 = vld [vmem:[%s852_s10] ss:$0 sm:$0xff] }
 0x2d9   :  { %v229_v43 = vsub.f32 %v214_v33, %v227_v41  ;;  %v232_v44 = vsel %vm55_vm0, %v230_v42, 0.0 }
 0x2da   :  { %233 = vadd.xlane.f32.xlu0 %v232_v44 }
 0x2db   :  { %v231_v45 = vmul.f32 %v229_v43, %v229_v43 }
 0x2dd   :  { %v235_v46 = vsel %vm55_vm0, %v231_v45, 0.0  ;;  %v633_v45 = vld [vmem:[%s853_s13] sm:$0xff]  }
 0x2de   :  { %236 = vadd.xlane.f32.xlu1 %v235_v46  ;;  %v634_v46 = vld [vmem:[%s853_s13 + $0x8] sm:$0xff]  }
 0x367   :  { %v234_v51 = vpop.xlane.xlu0 %233 }
 0x368   :  { %v238_v52 = vmul.f32 0.015625, %v234_v51 }
 0x36a   :  { %v240_v53 = vadd.f32 1e-05, %v238_v52 }
 0x36b   :  { %v237_v54 = vpop.xlane.xlu1 %236 }
 0x36c   :  { %639 = vrsqrt.f32 %v240_v53  ;;  %v239_v55 = vmul.f32 0.015625, %v237_v54 }
 0x36e   :  { %v241_v56 = vadd.f32 1e-05, %v239_v55 }
 0x370   :  { %641 = vrsqrt.f32 %v241_v56 }
 0x376   :  { %v640_v57 = vpop.eup %639 }
 0x377   :  { %v244_v59 = vmul.f32 %v640_v57, %v228_v39 }
 0x379   :  { %v252_v60 = vmul.f32 %v544_v58, %v244_v59 }
 0x37a   :  { %v642_v61 = vpop.eup %641 }
 0x37b   :  { %v245_v63 = vmul.f32 %v642_v61, %v229_v43  ;;  %v260_v2 = vadd.f32 %v545_v62, %v252_v60 }
 0x37d   :  { %v253_v1 = vmul.f32 %v544_v58, %v245_v63  ;;  %v262_v4 = vmax.f32 %v260_v2, 0.0 }
 0x37f   :  { %v261_v3 = vadd.f32 %v545_v62, %v253_v1 }
 0x381   :  { %v263_v5 = vmax.f32 %v261_v3, 0.0 }
 0x383   :  { %v264_v6 = vpack.c.bf16 %v263_v5, %v262_v4 }
 0x385   :  { %601 = vmatmul.mubr.msk.bf16.vlgmr.msra.gmra.mrb[4].mxu0 %vm55_vm0, %v264_v6 }
 0x458   :  { %v341_v8 = vpop.f32.mrb[4].mxu0 }
 0x459   :  { %v342_v9 = vadd.f32 %v546_v7, %v341_v8  ;;  %v602_v10 = vpop.f32.mrb[5].mxu0 }
 0x45a   :  { %v344_v11 = vpop.f32.mrb[6].mxu0 }
 0x45b   :  { %v345_v12 = vadd.f32 %v546_v7, %v344_v11  ;;  %v603_v13 = vpop.f32.mrb[7].mxu0  ;;  %v350_v14 = vsel %vm172_vm3, %v342_v9, 0.0 }
 0x45c   :  { %351 = vadd.xlane.f32.xlu1 %v350_v14 }
 0x45d   :  { %v353_v15 = vsel %vm172_vm3, %v345_v12, 0.0 }
 0x460   :  { %354 = vadd.xlane.f32.xlu1 %v353_v15 }
 0x4e9   :  { %v352_v16 = vpop.xlane.xlu1 %351 }
 0x4ea   :  { %v357_v17 = vmul.f32 0.03125, %v352_v16 }
 0x4ec   :  { %v359_v18 = vsub.f32 %v342_v9, %v357_v17 }
 0x4ed   :  { %v355_v19 = vpop.xlane.xlu1 %354 }
 0x4ee   :  { %v358_v20 = vmul.f32 0.03125, %v355_v19  ;;  %v361_v21 = vmul.f32 %v359_v18, %v359_v18 }
 0x4f0   :  { %v360_v22 = vsub.f32 %v345_v12, %v358_v20  ;;  %v363_v23 = vsel %vm172_vm3, %v361_v21, 0.0 }
 0x4f1   :  { %364 = vadd.xlane.f32.xlu1 %v363_v23 }
 0x4f2   :  { %v362_v24 = vmul.f32 %v360_v22, %v360_v22 }
 0x4f4   :  { %v366_v25 = vsel %vm172_vm3, %v362_v24, 0.0 }
 0x4f5   :  { %367 = vadd.xlane.f32.xlu1 %v366_v25 }
 0x57e   :  { %v365_v28 = vpop.xlane.xlu1 %364 }
 0x57f   :  { %v369_v29 = vmul.f32 0.03125, %v365_v28 }
 0x581   :  { %v371_v30 = vadd.f32 1e-05, %v369_v29 }
 0x582   :  { %v368_v31 = vpop.xlane.xlu1 %367 }
 0x583   :  { %643 = vrsqrt.f32 %v371_v30  ;;  %v370_v32 = vmul.f32 0.03125, %v368_v31 }
 0x585   :  { %v372_v33 = vadd.f32 1e-05, %v370_v32 }
 0x587   :  { %645 = vrsqrt.f32 %v372_v33 }
 0x58d   :  { %v644_v34 = vpop.eup %643 }
 0x58e   :  { %v375_v35 = vmul.f32 %v644_v34, %v359_v18 }
 0x590   :  { %v383_v38 = vmul.f32 %v552_v36, %v375_v35 }
 0x591   :  { %v646_v37 = vpop.eup %645 }
 0x592   :  { %v376_v39 = vmul.f32 %v646_v37, %v360_v22  ;;  %v391_v42 = vadd.f32 %v553_v40, %v383_v38 }
 0x594   :  { %v384_v41 = vmul.f32 %v552_v36, %v376_v39 }
 0x596   :  { %v392_v43 = vadd.f32 %v553_v40, %v384_v41 }
 0x598   :  { %v393_v44 = vpack.c.bf16 %v392_v43, %v391_v42 }
 0x59a   :  { %609 = vmatmul.mubr.msk.bf16.vlgmr.msra.gmra.mrb[4].mxu1 %vm172_vm3, %v393_v44 }
 0x59b   :  { %616 = vmatprep.mubr.msk.bf16.mxu1 %vm648_vm1, %v647_v0  ;;  %613 = vmatpush3.bf16.msra.mxu1 %v633_v45 }
 0x59c   :  { %614 = vmatprep.subr.bf16.mxu1 %v647_v0  ;;  %v558_v0 = vld [vmem:[%s855_s14] ss:$0 sm:$0xff] }
 0x59f   :  { %615 = vmatpush3.bf16.msra.mxu1 %v634_v46 }
 0x66d   :  { %v454_v48 = vpop.f32.mrb[4].mxu1 }
 0x66e   :  { %v455_v49 = vadd.f32 %v554_v47, %v454_v48  ;;  %v610_v50 = vpop.f32.mrb[5].mxu1 }
 0x66f   :  { %v457_v51 = vpop.f32.mrb[6].mxu1 }
 0x670   :  { %v458_v52 = vadd.f32 %v554_v47, %v457_v51  ;;  %v611_v53 = vpop.f32.mrb[7].mxu1  ;;  %v461_v54 = vmax.f32 %v455_v49, 0.0 }
 0x672   :  { %v462_v55 = vmax.f32 %v458_v52, 0.0 }
 0x674   :  { %v463_v56 = vpack.c.bf16 %v462_v55, %v461_v54 }
 0x676   :  { %617 = vmatmul.mubr.msk.bf16.vlgmr.msra.gmra.mrb[8].mxu1 %vm172_vm3, %v463_v56 }
 0x749   :  { %v524_v57 = vpop.f32.mrb[8].mxu1 }
 0x74a   :  { %v525_v58 = vadd.f32 %v558_v0, %v524_v57  ;;  %v618_v59 = vpop.f32.mrb[9].mxu1 }
 0x74b   :  { %v527_v60 = vpop.f32.mrb[10].mxu1 }
 0x74c   :  { %531 = vst [vmem:[%s856_s15] sm:$0xff] %v525_v58  ;;  %v528_v61 = vadd.f32 %v558_v0, %v527_v60  ;;  %v619_v62 = vpop.f32.mrb[11].mxu1 }
 0x74e   :  { %532 = vst [vmem:[%s856_s15 + $0x8] sm:$0xff] %v528_v61 }

</bundles_post_ra>
